<compile_context>
chip_gen: v6e
topology: v6e:2x2x1
jax: 0.10.0
libtpu: 0.0.40
codegen_flags: <defaults>
</compile_context>

<pallas_src>
import jax
import jax.numpy as jnp
from jax import lax
from jax.experimental import pallas as pl
from jax.experimental.pallas import tpu as pltpu

# ---------------- deterministic synthetic config ----------------
B = 8            # batch (= args.batch_size)
C = 4            # input channels
H = W = 16       # spatial
P = H * W        # pixels per image (256) -> lane axis inside the kernel
V = 2            # two augmented views, stacked along rows
K = 32           # backbone stem channels
D = 128          # backbone feature dim (analogue of 512 for ResNet18)
NC = 100         # CIFAR-100 classes
NC_PAD = 128     # class dim padded to a full lane tile
DN = D + NC_PAD  # fused head width (256) -- one MXU pass
LAMBD = 0.005    # args.lambd
ALPHA0 = 0.5
TEMP = 9000.0
BN_EPS = 1e-5
NEG_INF = -1e30

_VMEM = pl.BlockSpec(memory_space=pltpu.MemorySpace.VMEM)
_SMEM = pl.BlockSpec(memory_space=pltpu.MemorySpace.SMEM)


# ---------------- fused backbone(x2) + Barlow-Twins loss kernel ----------------
def barlow_twins_kernel(x_ref, wc_ref, wcat_ref, labels_ref, epochs_ref,
                        logits1_ref, alpha_ref, loss_ref):
    # x_ref:      (V*B, C, P)    bf16   both views, pixels lane-dense
    # wc_ref:     (K, C)         bf16   1x1 conv stem weight (pre-transposed)
    # wcat_ref:   (K, D+NC_PAD)  bf16   fused [feature | class] head
    # labels_ref: (V*B, 1) int32        labels duplicated for both views
    # epochs_ref: (1,) int32            current epoch (SMEM scalar)

    # ----- stem: 1x1 conv as batched matmul + ReLU + global-average-pool -----
    x = x_ref[...]                                                     # (2B, C, P)
    wc_b = jnp.broadcast_to(wc_ref[...][None], (V * B, K, C))          # tiny (2B,K,C)
    h = jnp.einsum('bkc,bcp->bkp', wc_b, x,
                   preferred_element_type=jnp.float32)                 # (2B, K, P) f32
    pooled = jnp.mean(jnp.maximum(h, 0.0), axis=-1)                    # (2B, K) f32

    # ----- fused heads: single 256-wide MXU pass, free lane-tile slices -----
    out = jnp.dot(pooled.astype(jnp.bfloat16), wcat_ref[...],
                  preferred_element_type=jnp.float32)                  # (2B, 256)
    feat = out[:, :D]                                                  # (2B, D)
    logits = out[:, D:]                                                # (2B, NC_PAD)

    logits1_ref[...] = logits[:B]                                      # lane-dense store

    # ----- Barlow-Twins cross-correlation loss (f32) -----
    def batchnorm(z):  # BatchNorm1d(affine=False), training-mode batch statistics
        mean = jnp.mean(z, axis=0, keepdims=True)
        var = jnp.mean((z - mean) ** 2, axis=0, keepdims=True)         # biased variance
        return (z - mean) * lax.rsqrt(var + BN_EPS)

    z1n = batchnorm(feat[:B])
    z2n = batchnorm(feat[B:])

    # c = bn(z1).T @ bn(z2) / batch_size -- contract over the batch axis.
    # Kept f32 (correlations get squared below); the emulated-f32 MXU cost is trivial.
    c = lax.dot_general(z1n, z2n, (((0,), (0,)), ((), ())),
                        preferred_element_type=jnp.float32) / float(B)  # (D, D)

    row = lax.broadcasted_iota(jnp.int32, (D, D), 0)
    col = lax.broadcasted_iota(jnp.int32, (D, D), 1)
    # single masked row-reduce -> (1, D) diagonal vector; all diag stats from it
    diag_vec = jnp.sum(jnp.where(row == col, c, 0.0), axis=0, keepdims=True)
    sum_sq = jnp.sum(c * c)
    diag_sq = jnp.sum(diag_vec * diag_vec)
    diag_lin = jnp.sum(diag_vec)
    on_diag = diag_sq - 2.0 * diag_lin + float(D)   # sum((diag(c)-1)^2)
    off_diag = sum_sq - diag_sq                     # sum(offdiag(c)^2)
    loss_bt = on_diag + LAMBD * off_diag

    # ----- fused cross-entropy (mean reduction) over both views at once -----
    labels = labels_ref[...]                                            # (2B, 1) int32
    cls = lax.broadcasted_iota(jnp.int32, (V * B, NC_PAD), 1)
    lg = jnp.where(cls < NC, logits, NEG_INF)                           # mask padded cols
    onehot = (cls == labels).astype(jnp.float32)                        # labels < NC always
    m = jnp.max(lg, axis=1, keepdims=True)
    lse = m + jnp.log(jnp.sum(jnp.exp(lg - m), axis=1, keepdims=True))
    nll = lse - jnp.sum(onehot * lg, axis=1, keepdims=True)             # (2B, 1)
    lc1 = jnp.sum(nll[:B]) / float(B)
    lc2 = jnp.sum(nll[B:]) / float(B)

    ep = epochs_ref[0].astype(jnp.float32)
    alpha = ALPHA0 + (ep - 1.0) / 400.0
    loss = alpha * (lc1 + lc2) + (1.0 - alpha) * (loss_bt / TEMP)

    alpha_ref[0] = alpha
    loss_ref[0] = loss


# ---------------- full forward (mirrors BarlowTwins.forward) ----------------
@jax.jit
def barlow_twins_forward(params, y1, y2, labels, epochs):
    wc_t, wcat = params
    # glue: stack views; NCHW -> (2B, C, H*W) keeps pixels on the lane axis, bf16 for MXU
    y = jnp.concatenate([y1, y2], axis=0)                     # (2B, C, H, W)
    x = y.reshape(V * B, C, P).astype(jnp.bfloat16)           # (2B, C, P)
    labels2 = jnp.concatenate([labels, labels], axis=0).reshape(V * B, 1).astype(jnp.int32)
    epochs_arr = jnp.reshape(epochs, (1,)).astype(jnp.int32)

    cost = pl.CostEstimate(
        flops=2 * V * B * K * C * P + 2 * V * B * K * DN + 2 * D * D * B,
        transcendentals=V * B * NC_PAD + V * B + 2 * D,
        bytes_accessed=(x.size * 2 + wc_t.size * 2 + wcat.size * 2
                        + labels2.size * 4 + B * NC_PAD * 4 + 12),
    )

    logits1_pad, alpha, loss = pl.pallas_call(
        barlow_twins_kernel,
        out_shape=(jax.ShapeDtypeStruct((B, NC_PAD), jnp.float32),
                   jax.ShapeDtypeStruct((1,), jnp.float32),
                   jax.ShapeDtypeStruct((1,), jnp.float32)),
        in_specs=[_VMEM, _VMEM, _VMEM, _VMEM, _SMEM],
        out_specs=(_VMEM, _SMEM, _SMEM),
        cost_estimate=cost,
    )(x, wc_t, wcat, labels2, epochs_arr)

    return alpha[0], loss[0], logits1_pad[:, :NC]


def make_params(key):
    k1, k2, k3 = jax.random.split(key, 3)
    # deterministic parameter init (fan-in scaled normals)
    wc = jax.random.normal(k1, (C, K), jnp.float32) * (1.0 / jnp.sqrt(C))
    wf = jax.random.normal(k2, (K, D), jnp.float32) * (1.0 / jnp.sqrt(K))
    wl = jax.random.normal(k3, (D, NC), jnp.float32) * (1.0 / jnp.sqrt(D))
    # pad classes to a full lane tile, fold the feature head into the class head,
    # and concatenate both heads into one (K, 256) weight -> single MXU pass.
    wl_pad = jnp.zeros((D, NC_PAD), jnp.float32).at[:, :NC].set(wl)
    wcat = jnp.concatenate([wf, wf @ wl_pad], axis=1)          # (K, D+NC_PAD) f32
    wc_t = wc.T                                                # (K, C) for lane-major stem
    return (wc_t.astype(jnp.bfloat16), wcat.astype(jnp.bfloat16))


if __name__ == "__main__":
    key = jax.random.PRNGKey(0)
    kp, k1, k2, k3 = jax.random.split(key, 4)

    params = make_params(kp)
    y1 = jax.random.normal(k1, (B, C, H, W), jnp.float32)
    y2 = jax.random.normal(k2, (B, C, H, W), jnp.float32)
    labels = jax.random.randint(k3, (B,), 0, NC, dtype=jnp.int32)
    epochs = jnp.int32(3)

    alpha, loss, logits1 = barlow_twins_forward(params, y1, y2, labels, epochs)
    jax.block_until_ready((alpha, loss, logits1))

    assert logits1.shape == (B, NC)
    assert bool(jnp.isfinite(loss))
    assert bool(jnp.isfinite(alpha))
    print("KERNEL_OK")
</pallas_src>

<mosaic_0001>
module attributes {stable_mosaic.version = 11 : i64} {
  func.func @barlow_twins_kernel(%arg0: memref<16x4x256xbf16, #tpu.memory_space<vmem>>, %arg1: memref<32x4xbf16, #tpu.memory_space<vmem>>, %arg2: memref<32x256xbf16, #tpu.memory_space<vmem>>, %arg3: memref<16x1xi32, #tpu.memory_space<vmem>>, %arg4: memref<1xi32, #tpu.memory_space<smem>>, %arg5: memref<8x128xf32, #tpu.memory_space<vmem>>, %arg6: memref<1xf32, #tpu.memory_space<smem>>, %arg7: memref<1xf32, #tpu.memory_space<smem>>) attributes {dimension_semantics = [], scalar_prefetch = 0 : i64, scratch_operands = 0 : i64, tpu.core_type = #tpu.core_type<tc>} {
    %c0 = arith.constant 0 : index
    %c0_0 = arith.constant 0 : index
    %c0_1 = arith.constant 0 : index
    %0 = vector.load %arg0[%c0, %c0_0, %c0_1] : memref<16x4x256xbf16, #tpu.memory_space<vmem>>, vector<16x4x256xbf16>
    %c0_2 = arith.constant 0 : index
    %c0_3 = arith.constant 0 : index
    %1 = vector.load %arg1[%c0_2, %c0_3] : memref<32x4xbf16, #tpu.memory_space<vmem>>, vector<32x4xbf16>
    %2 = vector.shape_cast %1 : vector<32x4xbf16> to vector<1x32x4xbf16>
    %3 = vector.shape_cast %2 : vector<1x32x4xbf16> to vector<1x32x4xbf16>
    %4 = vector.broadcast %3 : vector<1x32x4xbf16> to vector<16x32x4xbf16>
    "tpu.trace_start"() <{level = 10 : i32, message = "bkc,bcp->bkp"}> : () -> ()
    %cst = arith.constant dense<0.000000e+00> : vector<16x32x256xf32>
    %5 = tpu.matmul %4, %0, %cst {dimension_numbers = #tpu.dot_dimension_numbers<[2], [1], [1], [2], [0, 0, 0, 1, 1, 2], [0], [0]>} : vector<16x32x4xbf16>, vector<16x4x256xbf16>, vector<16x32x256xf32> -> vector<16x32x256xf32>
    "tpu.trace_stop"() : () -> ()
    %cst_4 = arith.constant 0.000000e+00 : f32
    %6 = vector.broadcast %cst_4 : f32 to vector<16x32x256xf32>
    %7 = arith.maximumf %5, %6 : vector<16x32x256xf32>
    %cst_5 = arith.constant dense<0.000000e+00> : vector<16x32xf32>
    %8 = vector.multi_reduction <add>, %7, %cst_5 [2] : vector<16x32x256xf32> to vector<16x32xf32>
    %cst_6 = arith.constant 2.560000e+02 : f32
    %9 = vector.broadcast %cst_6 : f32 to vector<16x32xf32>
    %10 = arith.divf %8, %9 : vector<16x32xf32>
    %11 = arith.truncf %10 : vector<16x32xf32> to vector<16x32xbf16>
    %c0_7 = arith.constant 0 : index
    %c0_8 = arith.constant 0 : index
    %12 = vector.load %arg2[%c0_7, %c0_8] : memref<32x256xbf16, #tpu.memory_space<vmem>>, vector<32x256xbf16>
    %cst_9 = arith.constant dense<0.000000e+00> : vector<16x256xf32>
    %13 = tpu.matmul %11, %12, %cst_9 {dimension_numbers = #tpu.dot_dimension_numbers<[1], [0], [0], [1], [0, 0, 1, 1], [], []>} : vector<16x32xbf16>, vector<32x256xbf16>, vector<16x256xf32> -> vector<16x256xf32>
    %14 = vector.extract_strided_slice %13 {offsets = [0, 0], sizes = [16, 128], strides = [1, 1]} : vector<16x256xf32> to vector<16x128xf32>
    %15 = vector.extract_strided_slice %13 {offsets = [0, 128], sizes = [16, 128], strides = [1, 1]} : vector<16x256xf32> to vector<16x128xf32>
    %16 = vector.extract_strided_slice %15 {offsets = [0, 0], sizes = [8, 128], strides = [1, 1]} : vector<16x128xf32> to vector<8x128xf32>
    %c0_10 = arith.constant 0 : index
    %c0_11 = arith.constant 0 : index
    %17 = vector.load %arg5[%c0_10, %c0_11] : memref<8x128xf32, #tpu.memory_space<vmem>>, vector<8x128xf32>
    tpu.vector_store %arg5[%c0_10, %c0_11], %16 {strides = array<i32>} : memref<8x128xf32, #tpu.memory_space<vmem>>, vector<8x128xf32>,
    %18 = vector.extract_strided_slice %14 {offsets = [0, 0], sizes = [8, 128], strides = [1, 1]} : vector<16x128xf32> to vector<8x128xf32>
    %cst_12 = arith.constant dense<0.000000e+00> : vector<128xf32>
    %19 = vector.multi_reduction <add>, %18, %cst_12 [0] : vector<8x128xf32> to vector<128xf32>
    %20 = vector.shape_cast %19 : vector<128xf32> to vector<1x128xf32>
    %cst_13 = arith.constant 8.000000e+00 : f32
    %21 = vector.broadcast %cst_13 : f32 to vector<1x128xf32>
    %22 = arith.divf %20, %21 : vector<1x128xf32>
    %23 = vector.broadcast %22 : vector<1x128xf32> to vector<8x128xf32>
    %24 = arith.subf %18, %23 : vector<8x128xf32>
    %25 = arith.mulf %24, %24 : vector<8x128xf32>
    %cst_14 = arith.constant dense<0.000000e+00> : vector<128xf32>
    %26 = vector.multi_reduction <add>, %25, %cst_14 [0] : vector<8x128xf32> to vector<128xf32>
    %27 = vector.shape_cast %26 : vector<128xf32> to vector<1x128xf32>
    %cst_15 = arith.constant 8.000000e+00 : f32
    %28 = vector.broadcast %cst_15 : f32 to vector<1x128xf32>
    %29 = arith.divf %27, %28 : vector<1x128xf32>
    %30 = vector.broadcast %22 : vector<1x128xf32> to vector<8x128xf32>
    %31 = arith.subf %18, %30 : vector<8x128xf32>
    %cst_16 = arith.constant 9.99999974E-6 : f32
    %32 = vector.broadcast %cst_16 : f32 to vector<1x128xf32>
    %33 = arith.addf %29, %32 : vector<1x128xf32>
    %34 = math.rsqrt %33 : vector<1x128xf32>
    %35 = vector.broadcast %34 : vector<1x128xf32> to vector<8x128xf32>
    %36 = arith.mulf %31, %35 : vector<8x128xf32>
    %37 = vector.extract_strided_slice %14 {offsets = [8, 0], sizes = [8, 128], strides = [1, 1]} : vector<16x128xf32> to vector<8x128xf32>
    %cst_17 = arith.constant dense<0.000000e+00> : vector<128xf32>
    %38 = vector.multi_reduction <add>, %37, %cst_17 [0] : vector<8x128xf32> to vector<128xf32>
    %39 = vector.shape_cast %38 : vector<128xf32> to vector<1x128xf32>
    %cst_18 = arith.constant 8.000000e+00 : f32
    %40 = vector.broadcast %cst_18 : f32 to vector<1x128xf32>
    %41 = arith.divf %39, %40 : vector<1x128xf32>
    %42 = vector.broadcast %41 : vector<1x128xf32> to vector<8x128xf32>
    %43 = arith.subf %37, %42 : vector<8x128xf32>
    %44 = arith.mulf %43, %43 : vector<8x128xf32>
    %cst_19 = arith.constant dense<0.000000e+00> : vector<128xf32>
    %45 = vector.multi_reduction <add>, %44, %cst_19 [0] : vector<8x128xf32> to vector<128xf32>
    %46 = vector.shape_cast %45 : vector<128xf32> to vector<1x128xf32>
    %cst_20 = arith.constant 8.000000e+00 : f32
    %47 = vector.broadcast %cst_20 : f32 to vector<1x128xf32>
    %48 = arith.divf %46, %47 : vector<1x128xf32>
    %49 = vector.broadcast %41 : vector<1x128xf32> to vector<8x128xf32>
    %50 = arith.subf %37, %49 : vector<8x128xf32>
    %cst_21 = arith.constant 9.99999974E-6 : f32
    %51 = vector.broadcast %cst_21 : f32 to vector<1x128xf32>
    %52 = arith.addf %48, %51 : vector<1x128xf32>
    %53 = math.rsqrt %52 : vector<1x128xf32>
    %54 = vector.broadcast %53 : vector<1x128xf32> to vector<8x128xf32>
    %55 = arith.mulf %50, %54 : vector<8x128xf32>
    %cst_22 = arith.constant dense<0.000000e+00> : vector<128x128xf32>
    %56 = tpu.matmul %36, %55, %cst_22 {dimension_numbers = #tpu.dot_dimension_numbers<[0], [0], [1], [1], [0, 1, 1, 1], [], []>} : vector<8x128xf32>, vector<8x128xf32>, vector<128x128xf32> -> vector<128x128xf32>
    %cst_23 = arith.constant 8.000000e+00 : f32
    %57 = vector.broadcast %cst_23 : f32 to vector<128x128xf32>
    %58 = arith.divf %56, %57 : vector<128x128xf32>
    %59 = tpu.iota {dimensions = array<i32: 0>} : vector<128x128xi32>
    %60 = tpu.iota {dimensions = array<i32: 1>} : vector<128x128xi32>
    %61 = arith.cmpi eq, %59, %60 : vector<128x128xi32>
    %cst_24 = arith.constant 0.000000e+00 : f32
    %62 = vector.broadcast %cst_24 : f32 to vector<128x128xf32>
    %63 = arith.select %61, %58, %62 : vector<128x128xi1>, vector<128x128xf32>
    %cst_25 = arith.constant dense<0.000000e+00> : vector<128xf32>
    %64 = vector.multi_reduction <add>, %63, %cst_25 [0] : vector<128x128xf32> to vector<128xf32>
    %65 = vector.shape_cast %64 : vector<128xf32> to vector<1x128xf32>
    %66 = arith.mulf %58, %58 : vector<128x128xf32>
    %67 = vector.shape_cast %66 : vector<128x128xf32> to vector<1x128x128xf32>
    %cst_26 = arith.constant dense<0.000000e+00> : vector<1xf32>
    %68 = vector.multi_reduction <add>, %67, %cst_26 [1, 2] : vector<1x128x128xf32> to vector<1xf32>
    %69 = vector.shape_cast %68 : vector<1xf32> to vector<1x1x1xf32>
    %70 = vector.extract %69[0, 0, 0] : f32 from vector<1x1x1xf32>
    %71 = arith.mulf %65, %65 : vector<1x128xf32>
    %72 = vector.shape_cast %71 : vector<1x128xf32> to vector<1x1x128xf32>
    %cst_27 = arith.constant dense<0.000000e+00> : vector<1xf32>
    %73 = vector.multi_reduction <add>, %72, %cst_27 [1, 2] : vector<1x1x128xf32> to vector<1xf32>
    %74 = vector.shape_cast %73 : vector<1xf32> to vector<1x1x1xf32>
    %75 = vector.extract %74[0, 0, 0] : f32 from vector<1x1x1xf32>
    %76 = vector.shape_cast %65 : vector<1x128xf32> to vector<1x1x128xf32>
    %cst_28 = arith.constant dense<0.000000e+00> : vector<1xf32>
    %77 = vector.multi_reduction <add>, %76, %cst_28 [1, 2] : vector<1x1x128xf32> to vector<1xf32>
    %78 = vector.shape_cast %77 : vector<1xf32> to vector<1x1x1xf32>
    %79 = vector.extract %78[0, 0, 0] : f32 from vector<1x1x1xf32>
    %cst_29 = arith.constant 2.000000e+00 : f32
    %80 = arith.mulf %cst_29, %79 : f32
    %81 = arith.subf %75, %80 : f32
    %cst_30 = arith.constant 1.280000e+02 : f32
    %82 = arith.addf %81, %cst_30 : f32
    %83 = arith.subf %70, %75 : f32
    %cst_31 = arith.constant 5.000000e-03 : f32
    %84 = arith.mulf %cst_31, %83 : f32
    %85 = arith.addf %82, %84 : f32
    %c0_32 = arith.constant 0 : index
    %c0_33 = arith.constant 0 : index
    %86 = vector.load %arg3[%c0_32, %c0_33] : memref<16x1xi32, #tpu.memory_space<vmem>>, vector<16x1xi32>
    %87 = tpu.iota {dimensions = array<i32: 1>} : vector<16x128xi32>
    %c100_i32 = arith.constant 100 : i32
    %88 = vector.broadcast %c100_i32 : i32 to vector<16x128xi32>
    %89 = arith.cmpi slt, %87, %88 : vector<16x128xi32>
    %cst_34 = arith.constant -1.000000e+30 : f32
    %90 = vector.broadcast %cst_34 : f32 to vector<16x128xf32>
    %91 = arith.select %89, %15, %90 : vector<16x128xi1>, vector<16x128xf32>
    %92 = vector.broadcast %86 : vector<16x1xi32> to vector<16x128xi32>
    %93 = arith.cmpi eq, %87, %92 : vector<16x128xi32>
    %94 = arith.extui %93 : vector<16x128xi1> to vector<16x128xi32>
    %95 = arith.sitofp %94 : vector<16x128xi32> to vector<16x128xf32>
    %cst_35 = arith.constant dense<0xFF800000> : vector<16xf32>
    %96 = vector.multi_reduction <maximumf>, %91, %cst_35 [1] : vector<16x128xf32> to vector<16xf32>
    %97 = vector.shape_cast %96 : vector<16xf32> to vector<16x1xf32>
    %98 = vector.broadcast %97 : vector<16x1xf32> to vector<16x128xf32>
    %99 = arith.subf %91, %98 : vector<16x128xf32>
    %100 = math.exp %99 : vector<16x128xf32>
    %cst_36 = arith.constant dense<0.000000e+00> : vector<16xf32>
    %101 = vector.multi_reduction <add>, %100, %cst_36 [1] : vector<16x128xf32> to vector<16xf32>
    %102 = vector.shape_cast %101 : vector<16xf32> to vector<16x1xf32>
    %103 = math.log %102 : vector<16x1xf32>
    %104 = arith.addf %97, %103 : vector<16x1xf32>
    %105 = arith.mulf %95, %91 : vector<16x128xf32>
    %cst_37 = arith.constant dense<0.000000e+00> : vector<16xf32>
    %106 = vector.multi_reduction <add>, %105, %cst_37 [1] : vector<16x128xf32> to vector<16xf32>
    %107 = vector.shape_cast %106 : vector<16xf32> to vector<16x1xf32>
    %108 = arith.subf %104, %107 : vector<16x1xf32>
    %109 = vector.extract_strided_slice %108 {offsets = [0, 0], sizes = [8, 1], strides = [1, 1]} : vector<16x1xf32> to vector<8x1xf32>
    %110 = vector.shape_cast %109 : vector<8x1xf32> to vector<1x8x1xf32>
    %cst_38 = arith.constant dense<0.000000e+00> : vector<1xf32>
    %111 = vector.multi_reduction <add>, %110, %cst_38 [1, 2] : vector<1x8x1xf32> to vector<1xf32>
    %112 = vector.shape_cast %111 : vector<1xf32> to vector<1x1x1xf32>
    %113 = vector.extract %112[0, 0, 0] : f32 from vector<1x1x1xf32>
    %cst_39 = arith.constant 8.000000e+00 : f32
    %114 = arith.divf %113, %cst_39 : f32
    %115 = vector.extract_strided_slice %108 {offsets = [8, 0], sizes = [8, 1], strides = [1, 1]} : vector<16x1xf32> to vector<8x1xf32>
    %116 = vector.shape_cast %115 : vector<8x1xf32> to vector<1x8x1xf32>
    %cst_40 = arith.constant dense<0.000000e+00> : vector<1xf32>
    %117 = vector.multi_reduction <add>, %116, %cst_40 [1, 2] : vector<1x8x1xf32> to vector<1xf32>
    %118 = vector.shape_cast %117 : vector<1xf32> to vector<1x1x1xf32>
    %119 = vector.extract %118[0, 0, 0] : f32 from vector<1x1x1xf32>
    %cst_41 = arith.constant 8.000000e+00 : f32
    %120 = arith.divf %119, %cst_41 : f32
    %c0_42 = arith.constant 0 : index
    %121 = memref.load %arg4[%c0_42] : memref<1xi32, #tpu.memory_space<smem>>
    %122 = arith.sitofp %121 : i32 to f32
    %cst_43 = arith.constant 1.000000e+00 : f32
    %123 = arith.subf %122, %cst_43 : f32
    %cst_44 = arith.constant 4.000000e+02 : f32
    %124 = arith.divf %123, %cst_44 : f32
    %cst_45 = arith.constant 5.000000e-01 : f32
    %125 = arith.addf %cst_45, %124 : f32
    %126 = arith.addf %114, %120 : f32
    %127 = arith.mulf %125, %126 : f32
    %cst_46 = arith.constant 1.000000e+00 : f32
    %128 = arith.subf %cst_46, %125 : f32
    %cst_47 = arith.constant 9.000000e+03 : f32
    %129 = arith.divf %85, %cst_47 : f32
    %130 = arith.mulf %128, %129 : f32
    %131 = arith.addf %127, %130 : f32
    %c0_48 = arith.constant 0 : index
    %132 = memref.load %arg6[%c0_48] : memref<1xf32, #tpu.memory_space<smem>>
    memref.store %125, %arg6[%c0_48] : memref<1xf32, #tpu.memory_space<smem>>
    %c0_49 = arith.constant 0 : index
    %133 = memref.load %arg7[%c0_49] : memref<1xf32, #tpu.memory_space<smem>>
    memref.store %131, %arg7[%c0_49] : memref<1xf32, #tpu.memory_space<smem>>
    return
  }
}

</mosaic_0001>

<bundles_post_ra>
// kernel: barlow_twins_forward.1
= control target key start
LH: loop header
LB: loop body
LE: loop exit
PB: predicated region body
PF: predicated region fallthrough
CT: control target
= control target key end

     0   :  { %14 = vsyncpa [#allocation4], 0  ;;  %s3326_s0 = inlined_call_operand.vmem [shape: bf16[16,4,256], index: 0, kind: input, shape index: {}]   ;;  %s3327_s1 = inlined_call_operand.vmem [shape: bf16[32,4], index: 1, kind: input, shape index: {}]   ;;  %s3328_s2 = inlined_call_operand.vmem [shape: bf16[32,256], index: 2, kind: input, shape index: {}]   ;;  %s3329_s3 = inlined_call_operand.vmem [shape: s32[16,1], index: 3, kind: input, shape index: {}]   ;;  %s3330_s4 = inlined_call_operand.<no memory space> [shape: s32[1], index: 4, kind: input, shape index: {}]   ;;  %s3331_s5 = inlined_call_operand.hbm [shape: f32[8,128], index: 5, kind: output, shape index: {0}]   ;;  %s3332_s6 = inlined_call_operand.hbm [shape: f32[1], index: 6, kind: output, shape index: {1}]   ;;  %s3333_s7 = inlined_call_operand.hbm [shape: f32[1], index: 7, kind: output, shape index: {2}]  }
   0x1   :  { %15 = vsyncpa [#allocation5], 0  ;;  %v2624_v0 = vld.sshfl [vmem:[%s3326_s0] sm:$0x33 pattern:$0x76325410] }
   0x2   :  { %vm74_vm0 = vcmask 1041408   ;;  %v66_v1 = vcombine.high %v2624_v0, %v2624_v0  ;;  %v2628_v2 = vld.sshfl [vmem:[%s3326_s0 + $0x4] sm:$0x33 pattern:$0x76325410]  ;;  %v2836_v4 = vmov 0  }
   0x3   :  { %v76_v3 = vsel %vm74_vm0, %v2624_v0, 0  ;;  %113 = vmatprep.mubr.bf16.mxu0 %v2836_v4  ;;  %181 = vmatprep.mubr.bf16.mxu1 %v2836_v4  ;;  %v142_v5 = vcombine.high %v2628_v2, %v2628_v2  ;;  %v144_v6 = vsel %vm74_vm0, %v2628_v2, 0  ;;  %v2894_v7 = vld [vmem:[%s3327_s1] sm:$0xff]   ;;  %vm67_vm1 = vcmask 31744   ;;  %v2925_v18 = vld [vmem:[%s3327_s1 + $0x8] sm:$0xff]  }
   0x4   :  { %2772 = vset.pattern.permute.xlu1 %v2836_v4  ;;  %2625 = vmatprep.subr.msk.bf16.mxu0 %vm74_vm0, %v66_v1  ;;  %v2632_v8 = vld.sshfl [vmem:[%s3326_s0 + $0x8] sm:$0x33 pattern:$0x76325410] }
   0x5   :  { %2629 = vmatprep.subr.msk.bf16.mxu1 %vm74_vm0, %v142_v5  ;;  %96 = vmatpush1.bf16.msra.mxu0 %v76_v3  ;;  %v210_v9 = vcombine.high %v2632_v8, %v2632_v8  ;;  %v2636_v10 = vld.sshfl [vmem:[%s3326_s0 + $0xc] sm:$0x33 pattern:$0x76325410]  ;;  %v212_v11 = vsel %vm74_vm0, %v2632_v8, 0 }
   0x6   :  { %164 = vmatpush1.bf16.msra.mxu1 %v144_v6  ;;  %v278_v12 = vcombine.high %v2636_v10, %v2636_v10  ;;  %v280_v13 = vsel %vm74_vm0, %v2636_v10, 0  ;;  %v2640_v14 = vld.sshfl [vmem:[%s3326_s0 + $0x10] sm:$0x33 pattern:$0x76325410] }
   0x7   :  { %2633 = vmatprep.subr.msk.bf16.mxu0 %vm74_vm0, %v210_v9  ;;  %v346_v15 = vcombine.high %v2640_v14, %v2640_v14  ;;  %v2644_v16 = vld.sshfl [vmem:[%s3326_s0 + $0x14] sm:$0x33 pattern:$0x76325410] }
   0x8   :  { %2626 = vmatmul.mubr.msk.bf16.vlgmr.msra.gmra.mxu0 %vm67_vm1, %v2894_v7  ;;  %2637 = vmatprep.subr.msk.bf16.mxu1 %vm74_vm0, %v278_v12  ;;  %v414_v17 = vcombine.high %v2644_v16, %v2644_v16 }
   0x9   :  { %2630 = vmatmul.mubr.msk.bf16.vlgmr.msra.gmra.mxu1 %vm67_vm1, %v2894_v7  ;;  %232 = vmatpush1.bf16.msra.mxu0 %v212_v11 }
   0xa   :  { %300 = vmatpush1.bf16.msra.mxu1 %v280_v13  ;;  %123 = vmatprep.mubr.bf16.mxu0 %v2836_v4 }
   0xb   :  { %191 = vmatprep.mubr.bf16.mxu1 %v2836_v4  ;;  %2641 = vmatprep.subr.msk.bf16.mxu0 %vm74_vm0, %v346_v15 }
   0xc   :  { %2645 = vmatprep.subr.msk.bf16.mxu1 %vm74_vm0, %v414_v17 }
  0x10   :  { %2627 = vmatmul.mubr.msk.bf16.gmra.mxu0 %vm67_vm1, %v2925_v18 }
  0x11   :  { %2631 = vmatmul.mubr.msk.bf16.gmra.mxu1 %vm67_vm1, %v2925_v18  ;;  %249 = vmatprep.mubr.bf16.mxu0 %v2836_v4 }
  0x12   :  { %317 = vmatprep.mubr.bf16.mxu1 %v2836_v4 }
  0x13   :  { %16 = vsyncpa [#allocation8], 0  ;;  %v2648_v19 = vld.sshfl [vmem:[%s3326_s0 + $0x18] sm:$0x33 pattern:$0x76325410]  ;;  %s2565_s23 = scvt.s32.f32 %s3330_s4 }
  0x14   :  { %v2652_v20 = vld.sshfl [vmem:[%s3326_s0 + $0x1c] sm:$0x33 pattern:$0x76325410]  ;;  %v348_v21 = vsel %vm74_vm0, %v2640_v14, 0  ;;  %v416_v22 = vsel %vm74_vm0, %v2644_v16, 0  ;;  %v482_v23 = vcombine.high %v2648_v19, %v2648_v19 }
  0x15   :  { %v550_v24 = vcombine.high %v2652_v20, %v2652_v20  ;;  %v2656_v25 = vld.sshfl [vmem:[%s3326_s0 + $0x20] sm:$0x33 pattern:$0x76325410]  ;;  %v484_v27 = vsel %vm74_vm0, %v2648_v19, 0  ;;  %v552_v28 = vsel %vm74_vm0, %v2652_v20, 0 }
  0x16   :  { %v2660_v26 = vld.sshfl [vmem:[%s3326_s0 + $0x24] sm:$0x33 pattern:$0x76325410]  ;;  %v618_v29 = vcombine.high %v2656_v25, %v2656_v25  ;;  %v620_v33 = vsel %vm74_vm0, %v2656_v25, 0  ;;  %vm1682_vm2 = vcmask 130112  }
  0x17   :  { %v686_v30 = vcombine.high %v2660_v26, %v2660_v26  ;;  %v2664_v31 = vld.sshfl [vmem:[%s3326_s0 + $0x28] sm:$0x33 pattern:$0x76325410]  ;;  %v688_v34 = vsel %vm74_vm0, %v2660_v26, 0  ;;  %vm1689_vm3 = vcmask 195712  }
  0x18   :  { %2634 = vmatmul.mubr.msk.bf16.vlgmr.msra.gmra.mxu0 %vm67_vm1, %v2894_v7  ;;  %v2668_v32 = vld.sshfl [vmem:[%s3326_s0 + $0x2c] sm:$0x33 pattern:$0x76325410]  ;;  %v754_v35 = vcombine.high %v2664_v31, %v2664_v31  ;;  %v756_v39 = vsel %vm74_vm0, %v2664_v31, 0  ;;  %vm1696_vm4 = vcmask 261312  }
  0x19   :  { %2638 = vmatmul.mubr.msk.bf16.vlgmr.msra.gmra.mxu1 %vm67_vm1, %v2894_v7  ;;  %368 = vmatpush1.bf16.msra.mxu0 %v348_v21  ;;  %v822_v36 = vcombine.high %v2668_v32, %v2668_v32  ;;  %v2672_v37 = vld.sshfl [vmem:[%s3326_s0 + $0x30] sm:$0x33 pattern:$0x76325410]  ;;  %v824_v40 = vsel %vm74_vm0, %v2668_v32, 0  ;;  %vm1983_vm5 = vcmask 1041409  }
  0x1a   :  { %436 = vmatpush1.bf16.msra.mxu1 %v416_v22  ;;  %259 = vmatprep.mubr.bf16.mxu0 %v2836_v4  ;;  %v2676_v38 = vld.sshfl [vmem:[%s3326_s0 + $0x34] sm:$0x33 pattern:$0x76325410]  ;;  %v890_v41 = vcombine.high %v2672_v37, %v2672_v37  ;;  %v892_v45 = vsel %vm74_vm0, %v2672_v37, 0  ;;  %vm1985_vm6 = vcmask 1042434  }
  0x1b   :  { %327 = vmatprep.mubr.bf16.mxu1 %v2836_v4  ;;  %2649 = vmatprep.subr.msk.bf16.mxu0 %vm74_vm0, %v482_v23  ;;  %v958_v42 = vcombine.high %v2676_v38, %v2676_v38  ;;  %v2680_v43 = vld.sshfl [vmem:[%s3326_s0 + $0x38] sm:$0x33 pattern:$0x76325410]  ;;  %v960_v46 = vsel %vm74_vm0, %v2676_v38, 0  ;;  %vm1987_vm7 = vcmask 1043459  }
  0x1c   :  { %2653 = vmatprep.subr.msk.bf16.mxu1 %vm74_vm0, %v550_v24  ;;  %v2684_v44 = vld.sshfl [vmem:[%s3326_s0 + $0x3c] sm:$0x33 pattern:$0x76325410]  ;;  %v1026_v47 = vcombine.high %v2680_v43, %v2680_v43  ;;  %v1028_v49 = vsel %vm74_vm0, %v2680_v43, 0  ;;  %vm1989_vm8 = vcmask 1044484  }
  0x1d   :  { %v1094_v48 = vcombine.high %v2684_v44, %v2684_v44  ;;  %v1096_v50 = vsel %vm74_vm0, %v2684_v44, 0  ;;  %vm1991_vm9 = vcmask 1045509   ;;  %vm1993_vm10 = vcmask 1046534   ;;  %s2711_s24 = sadd.f32 -1.0, %s2565_s23  ;;  %s2838_s27 = smov [#allocation6]  }
  0x1e   :  { %vm1995_vm11 = vcmask 1047559   ;;  %vm2025_vm12 = vcmask 261120   ;;  %s2839_s30 = smov [#allocation3]  }
  0x1f   :  { %s2569_s25 = smul.f32 0.0025, %s2711_s24  ;;  %s2589_s8 = sshll.u32 %s2839_s30, 4  ;;  %s2590_s8 = int_to_ptr.vmem [resolvable:$true] %s2589_s8 }
  0x20   :  { %2635 = vmatmul.mubr.msk.bf16.gmra.mxu0 %vm67_vm1, %v2925_v18  ;;  %s2802_s9 = scalar_lea.vmem %s2590_s8, 128  ;;  %p2807_p1 = scmp.lt.s32.totalorder %s2590_s8, %s2590_s8 }
  0x21   :  { %2639 = vmatmul.mubr.msk.bf16.gmra.mxu1 %vm67_vm1, %v2925_v18  ;;  %385 = vmatprep.mubr.bf16.mxu0 %v2836_v4  ;;  %s3312_s26 = sadd.f32 0.5, %s2569_s25  ;;  %p2803_p0 = scmp.ne.s32.totalorder %s2590_s8, %s2802_s9 }
  0x22   :  { %453 = vmatprep.mubr.bf16.mxu1 %v2836_v4  ;;  %p2808_p2 = scmp.lt.s32.totalorder %s2802_s9, %s2802_s9 }
  0x23   :  { %2580 = sst [smem:[#allocation6]] %s3312_s26 }
  0x24   :  { %2600 = dma.smem_to_hbm %s2838_s27, 16, %s3332_s6, [#allocation5]  }
  0x25   :  { %p2809_p3 = por %p2808_p2, %p2807_p1 }
  0x27   :  { %p2810_p4 = pnand %p2809_p3, %p2803_p0 }
  0x28   :  { %2642 = vmatmul.mubr.msk.bf16.vlgmr.msra.gmra.mxu0 %vm67_vm1, %v2894_v7 }
  0x29   :  { %2646 = vmatmul.mubr.msk.bf16.vlgmr.msra.gmra.mxu1 %vm67_vm1, %v2894_v7  ;;  %504 = vmatpush1.bf16.msra.mxu0 %v484_v27 }
  0x2a   :  { %572 = vmatpush1.bf16.msra.mxu1 %v552_v28  ;;  %395 = vmatprep.mubr.bf16.mxu0 %v2836_v4 }
  0x2b   :  { %463 = vmatprep.mubr.bf16.mxu1 %v2836_v4  ;;  %2657 = vmatprep.subr.msk.bf16.mxu0 %vm74_vm0, %v618_v29 }
  0x2c   :  { %2661 = vmatprep.subr.msk.bf16.mxu1 %vm74_vm0, %v686_v30 }
  0x30   :  { %2643 = vmatmul.mubr.msk.bf16.gmra.mxu0 %vm67_vm1, %v2925_v18 }
  0x31   :  { %2647 = vmatmul.mubr.msk.bf16.gmra.mxu1 %vm67_vm1, %v2925_v18  ;;  %521 = vmatprep.mubr.bf16.mxu0 %v2836_v4 }
  0x32   :  { %589 = vmatprep.mubr.bf16.mxu1 %v2836_v4 }
  0x38   :  { %2650 = vmatmul.mubr.msk.bf16.vlgmr.msra.gmra.mxu0 %vm67_vm1, %v2894_v7 }
  0x39   :  { %2654 = vmatmul.mubr.msk.bf16.vlgmr.msra.gmra.mxu1 %vm67_vm1, %v2894_v7  ;;  %640 = vmatpush1.bf16.msra.mxu0 %v620_v33 }
  0x3a   :  { %708 = vmatpush1.bf16.msra.mxu1 %v688_v34  ;;  %531 = vmatprep.mubr.bf16.mxu0 %v2836_v4 }
  0x3b   :  { %599 = vmatprep.mubr.bf16.mxu1 %v2836_v4  ;;  %2665 = vmatprep.subr.msk.bf16.mxu0 %vm74_vm0, %v754_v35 }
  0x3c   :  { %2669 = vmatprep.subr.msk.bf16.mxu1 %vm74_vm0, %v822_v36 }
  0x40   :  { %2651 = vmatmul.mubr.msk.bf16.gmra.mxu0 %vm67_vm1, %v2925_v18 }
  0x41   :  { %2655 = vmatmul.mubr.msk.bf16.gmra.mxu1 %vm67_vm1, %v2925_v18  ;;  %657 = vmatprep.mubr.bf16.mxu0 %v2836_v4 }
  0x42   :  { %725 = vmatprep.mubr.bf16.mxu1 %v2836_v4 }
  0x48   :  { %2658 = vmatmul.mubr.msk.bf16.vlgmr.msra.gmra.mxu0 %vm67_vm1, %v2894_v7 }
  0x49   :  { %2662 = vmatmul.mubr.msk.bf16.vlgmr.msra.gmra.mxu1 %vm67_vm1, %v2894_v7  ;;  %776 = vmatpush1.bf16.msra.mxu0 %v756_v39 }
  0x4a   :  { %844 = vmatpush1.bf16.msra.mxu1 %v824_v40  ;;  %667 = vmatprep.mubr.bf16.mxu0 %v2836_v4 }
  0x4b   :  { %735 = vmatprep.mubr.bf16.mxu1 %v2836_v4  ;;  %2673 = vmatprep.subr.msk.bf16.mxu0 %vm74_vm0, %v890_v41 }
  0x4c   :  { %2677 = vmatprep.subr.msk.bf16.mxu1 %vm74_vm0, %v958_v42 }
  0x50   :  { %2659 = vmatmul.mubr.msk.bf16.gmra.mxu0 %vm67_vm1, %v2925_v18 }
  0x51   :  { %2663 = vmatmul.mubr.msk.bf16.gmra.mxu1 %vm67_vm1, %v2925_v18  ;;  %793 = vmatprep.mubr.bf16.mxu0 %v2836_v4 }
  0x52   :  { %861 = vmatprep.mubr.bf16.mxu1 %v2836_v4 }
  0x58   :  { %2666 = vmatmul.mubr.msk.bf16.vlgmr.msra.gmra.mxu0 %vm67_vm1, %v2894_v7 }
  0x59   :  { %2670 = vmatmul.mubr.msk.bf16.vlgmr.msra.gmra.mxu1 %vm67_vm1, %v2894_v7  ;;  %912 = vmatpush1.bf16.msra.mxu0 %v892_v45 }
  0x5a   :  { %980 = vmatpush1.bf16.msra.mxu1 %v960_v46  ;;  %803 = vmatprep.mubr.bf16.mxu0 %v2836_v4 }
  0x5b   :  { %871 = vmatprep.mubr.bf16.mxu1 %v2836_v4  ;;  %2681 = vmatprep.subr.msk.bf16.mxu0 %vm74_vm0, %v1026_v47 }
  0x5c   :  { %2685 = vmatprep.subr.msk.bf16.mxu1 %vm74_vm0, %v1094_v48  ;;  %vm2144_vm0 = vcmask 64512  }
  0x60   :  { %2667 = vmatmul.mubr.msk.bf16.gmra.mxu0 %vm67_vm1, %v2925_v18 }
  0x61   :  { %2671 = vmatmul.mubr.msk.bf16.gmra.mxu1 %vm67_vm1, %v2925_v18  ;;  %929 = vmatprep.mubr.bf16.mxu0 %v2836_v4 }
  0x62   :  { %997 = vmatprep.mubr.bf16.mxu1 %v2836_v4 }
  0x68   :  { %2674 = vmatmul.mubr.msk.bf16.vlgmr.msra.gmra.mxu0 %vm67_vm1, %v2894_v7 }
  0x69   :  { %2678 = vmatmul.mubr.msk.bf16.vlgmr.msra.gmra.mxu1 %vm67_vm1, %v2894_v7  ;;  %1048 = vmatpush1.bf16.msra.mxu0 %v1028_v49 }
  0x6a   :  { %1116 = vmatpush1.bf16.msra.mxu1 %v1096_v50  ;;  %939 = vmatprep.mubr.bf16.mxu0 %v2836_v4 }
  0x6b   :  { %1007 = vmatprep.mubr.bf16.mxu1 %v2836_v4 }
  0x70   :  { %2675 = vmatmul.mubr.msk.bf16.gmra.mxu0 %vm67_vm1, %v2925_v18 }
  0x71   :  { %2679 = vmatmul.mubr.msk.bf16.gmra.mxu1 %vm67_vm1, %v2925_v18  ;;  %1065 = vmatprep.mubr.bf16.mxu0 %v2836_v4 }
  0x72   :  { %1133 = vmatprep.mubr.bf16.mxu1 %v2836_v4 }
  0x78   :  { %2682 = vmatmul.mubr.msk.bf16.vlgmr.msra.gmra.mxu0 %vm67_vm1, %v2894_v7 }
  0x79   :  { %2686 = vmatmul.mubr.msk.bf16.vlgmr.msra.gmra.mxu1 %vm67_vm1, %v2894_v7  ;;  %1075 = vmatprep.mubr.bf16.mxu0 %v2836_v4 }
  0x7a   :  { %1143 = vmatprep.mubr.bf16.mxu1 %v2836_v4 }
  0x80   :  { %2683 = vmatmul.mubr.msk.bf16.gmra.mxu0 %vm67_vm1, %v2925_v18 }
  0x81   :  { %2687 = vmatmul.mubr.msk.bf16.gmra.mxu1 %vm67_vm1, %v2925_v18  ;;  %2061 = vmatprep.mubr.bf16.mxu0 %v2836_v4 }
  0xc8   :  { %v115_v51 = vpop.f32.mrf.mxu0 }
  0xc9   :  { %v183_v52 = vpop.f32.mrf.mxu1  ;;  %v1154_v55 = vmax.f32 %v115_v51, 0.0 }
  0xca   :  { %v1162_v53 = vmax.f32 %v183_v52, 0.0  ;;  %v117_v54 = vpop.f32.mrf.mxu0 }
  0xcb   :  { %v1155_v56 = vmax.f32 %v117_v54, 0.0  ;;  %v185_v57 = vpop.f32.mrf.mxu1 }
  0xcc   :  { %v1163_v58 = vmax.f32 %v185_v57, 0.0  ;;  %v119_v59 = vpop.f32.mrf.mxu0 }
  0xcd   :  { %v187_v60 = vpop.f32.mrf.mxu1  ;;  %v1282_v61 = vadd.f32 %v1155_v56, %v1154_v55  ;;  %v1156_v0 = vmax.f32 %v119_v59, 0.0 }
  0xce   :  { %v121_v62 = vpop.f32.mrf.mxu0  ;;  %v1294_v63 = vadd.f32 %v1163_v58, %v1162_v53  ;;  %v1164_v3 = vmax.f32 %v187_v60, 0.0 }
  0xcf   :  { %v1157_v1 = vmax.f32 %v121_v62, 0.0  ;;  %v189_v2 = vpop.f32.mrf.mxu1  ;;  %1283 = vadd.xlane.f32.xlu0 %v1282_v61 }
  0xd0   :  { %v1165_v5 = vmax.f32 %v189_v2, 0.0  ;;  %1295 = vadd.xlane.f32.xlu1 %v1294_v63  ;;  %v125_v6 = vpop.f32.mrf.mxu0 }
  0xd1   :  { %v193_v7 = vpop.f32.mrf.mxu1  ;;  %v1285_v8 = vadd.f32 %v1157_v1, %v1156_v0  ;;  %v1158_v11 = vmax.f32 %v125_v6, 0.0 }
  0xd2   :  { %v127_v9 = vpop.f32.mrf.mxu0  ;;  %v1297_v10 = vadd.f32 %v1165_v5, %v1164_v3  ;;  %v1166_v15 = vmax.f32 %v193_v7, 0.0 }
  0xd3   :  { %v1159_v12 = vmax.f32 %v127_v9, 0.0  ;;  %v195_v13 = vpop.f32.mrf.mxu1  ;;  %1286 = vadd.xlane.f32.xlu0 %v1285_v8 }
  0xd4   :  { %1298 = vadd.xlane.f32.xlu1 %v1297_v10  ;;  %v129_v14 = vpop.f32.mrf.mxu0  ;;  %v1167_v16 = vmax.f32 %v195_v13, 0.0 }
  0xd5   :  { %v197_v17 = vpop.f32.mrf.mxu1  ;;  %v1288_v18 = vadd.f32 %v1159_v12, %v1158_v11  ;;  %v1160_v20 = vmax.f32 %v129_v14, 0.0 }
  0xd6   :  { %v131_v19 = vpop.f32.mrf.mxu0  ;;  %v1300_v26 = vadd.f32 %v1167_v16, %v1166_v15  ;;  %v1168_v29 = vmax.f32 %v197_v17, 0.0 }
  0xd7   :  { %v1161_v21 = vmax.f32 %v131_v19, 0.0  ;;  %v199_v22 = vpop.f32.mrf.mxu1  ;;  %1289 = vadd.xlane.f32.xlu0 %v1288_v18 }
  0xd8   :  { %v251_v23 = vpop.f32.mrf.mxu0  ;;  %v1169_v24 = vmax.f32 %v199_v22, 0.0 }
  0xd9   :  { %v319_v25 = vpop.f32.mrf.mxu1  ;;  %v1291_v27 = vadd.f32 %v1161_v21, %v1160_v20  ;;  %v1170_v30 = vmax.f32 %v251_v23, 0.0 }
  0xda   :  { %v253_v28 = vpop.f32.mrf.mxu0  ;;  %v1178_v34 = vmax.f32 %v319_v25, 0.0  ;;  %v1303_v37 = vadd.f32 %v1169_v24, %v1168_v29 }
  0xdb   :  { %v1171_v31 = vmax.f32 %v253_v28, 0.0  ;;  %v321_v32 = vpop.f32.mrf.mxu1  ;;  %1301 = vadd.xlane.f32.xlu0 %v1300_v26  ;;  %1292 = vadd.xlane.f32.xlu1 %v1291_v27 }
  0xdc   :  { %v255_v33 = vpop.f32.mrf.mxu0  ;;  %v1179_v35 = vmax.f32 %v321_v32, 0.0 }
  0xdd   :  { %v323_v36 = vpop.f32.mrf.mxu1  ;;  %v1306_v38 = vadd.f32 %v1171_v31, %v1170_v30  ;;  %v1172_v40 = vmax.f32 %v255_v33, 0.0 }
  0xde   :  { %v257_v39 = vpop.f32.mrf.mxu0  ;;  %v1318_v46 = vadd.f32 %v1179_v35, %v1178_v34  ;;  %v1180_v49 = vmax.f32 %v323_v36, 0.0 }
  0xdf   :  { %v1173_v41 = vmax.f32 %v257_v39, 0.0  ;;  %v325_v42 = vpop.f32.mrf.mxu1  ;;  %1304 = vadd.xlane.f32.xlu1 %v1303_v37  ;;  %1307 = vadd.xlane.f32.xlu0 %v1306_v38 }
  0xe0   :  { %v261_v43 = vpop.f32.mrf.mxu0  ;;  %v1181_v44 = vmax.f32 %v325_v42, 0.0 }
  0xe1   :  { %v329_v45 = vpop.f32.mrf.mxu1  ;;  %v1309_v47 = vadd.f32 %v1173_v41, %v1172_v40  ;;  %v1174_v50 = vmax.f32 %v261_v43, 0.0 }
  0xe2   :  { %v263_v48 = vpop.f32.mrf.mxu0  ;;  %v1182_v54 = vmax.f32 %v329_v45, 0.0  ;;  %v1321_v57 = vadd.f32 %v1181_v44, %v1180_v49 }
  0xe3   :  { %v1175_v51 = vmax.f32 %v263_v48, 0.0  ;;  %v331_v52 = vpop.f32.mrf.mxu1  ;;  %1319 = vadd.xlane.f32.xlu0 %v1318_v46  ;;  %1310 = vadd.xlane.f32.xlu1 %v1309_v47 }
  0xe4   :  { %v265_v53 = vpop.f32.mrf.mxu0  ;;  %v1183_v55 = vmax.f32 %v331_v52, 0.0 }
  0xe5   :  { %v333_v56 = vpop.f32.mrf.mxu1  ;;  %v1312_v58 = vadd.f32 %v1175_v51, %v1174_v50  ;;  %v1176_v60 = vmax.f32 %v265_v53, 0.0 }
  0xe6   :  { %v267_v59 = vpop.f32.mrf.mxu0  ;;  %v1324_v2 = vadd.f32 %v1183_v55, %v1182_v54  ;;  %v1184_v6 = vmax.f32 %v333_v56, 0.0 }
  0xe7   :  { %v1177_v61 = vmax.f32 %v267_v59, 0.0  ;;  %v335_v62 = vpop.f32.mrf.mxu1  ;;  %1322 = vadd.xlane.f32.xlu1 %v1321_v57  ;;  %1313 = vadd.xlane.f32.xlu0 %v1312_v58 }
  0xe8   :  { %v387_v63 = vpop.f32.mrf.mxu0  ;;  %v1185_v0 = vmax.f32 %v335_v62, 0.0 }
  0xe9   :  { %v455_v1 = vpop.f32.mrf.mxu1  ;;  %v1315_v3 = vadd.f32 %v1177_v61, %v1176_v60  ;;  %v1186_v7 = vmax.f32 %v387_v63, 0.0 }
  0xea   :  { %v389_v5 = vpop.f32.mrf.mxu0  ;;  %v1194_v11 = vmax.f32 %v455_v1, 0.0  ;;  %v1327_v14 = vadd.f32 %v1185_v0, %v1184_v6 }
  0xeb   :  { %v1187_v8 = vmax.f32 %v389_v5, 0.0  ;;  %v457_v9 = vpop.f32.mrf.mxu1  ;;  %1325 = vadd.xlane.f32.xlu0 %v1324_v2  ;;  %1316 = vadd.xlane.f32.xlu1 %v1315_v3 }
  0xec   :  { %v391_v10 = vpop.f32.mrf.mxu0  ;;  %v1195_v12 = vmax.f32 %v457_v9, 0.0 }
  0xed   :  { %v459_v13 = vpop.f32.mrf.mxu1  ;;  %v1330_v15 = vadd.f32 %v1187_v8, %v1186_v7  ;;  %v1188_v17 = vmax.f32 %v391_v10, 0.0 }
  0xee   :  { %v393_v16 = vpop.f32.mrf.mxu0  ;;  %v1342_v23 = vadd.f32 %v1195_v12, %v1194_v11  ;;  %v1196_v26 = vmax.f32 %v459_v13, 0.0 }
  0xef   :  { %v1189_v18 = vmax.f32 %v393_v16, 0.0  ;;  %v461_v19 = vpop.f32.mrf.mxu1  ;;  %1328 = vadd.xlane.f32.xlu1 %v1327_v14  ;;  %1331 = vadd.xlane.f32.xlu0 %v1330_v15 }
  0xf0   :  { %v397_v20 = vpop.f32.mrf.mxu0  ;;  %v1197_v21 = vmax.f32 %v461_v19, 0.0 }
  0xf1   :  { %v465_v22 = vpop.f32.mrf.mxu1  ;;  %v1333_v24 = vadd.f32 %v1189_v18, %v1188_v17  ;;  %v1190_v27 = vmax.f32 %v397_v20, 0.0 }
  0xf2   :  { %v399_v25 = vpop.f32.mrf.mxu0  ;;  %v1198_v31 = vmax.f32 %v465_v22, 0.0  ;;  %v1345_v34 = vadd.f32 %v1197_v21, %v1196_v26 }
  0xf3   :  { %v1191_v28 = vmax.f32 %v399_v25, 0.0  ;;  %v467_v29 = vpop.f32.mrf.mxu1  ;;  %1343 = vadd.xlane.f32.xlu0 %v1342_v23  ;;  %1334 = vadd.xlane.f32.xlu1 %v1333_v24 }
  0xf4   :  { %v401_v30 = vpop.f32.mrf.mxu0  ;;  %v1199_v32 = vmax.f32 %v467_v29, 0.0 }
  0xf5   :  { %v469_v33 = vpop.f32.mrf.mxu1  ;;  %v1336_v35 = vadd.f32 %v1191_v28, %v1190_v27  ;;  %v1192_v37 = vmax.f32 %v401_v30, 0.0 }
  0xf6   :  { %v403_v36 = vpop.f32.mrf.mxu0  ;;  %v1348_v43 = vadd.f32 %v1199_v32, %v1198_v31  ;;  %v1200_v46 = vmax.f32 %v469_v33, 0.0 }
  0xf7   :  { %v1193_v38 = vmax.f32 %v403_v36, 0.0  ;;  %v471_v39 = vpop.f32.mrf.mxu1  ;;  %1346 = vadd.xlane.f32.xlu1 %v1345_v34  ;;  %1337 = vadd.xlane.f32.xlu0 %v1336_v35 }
  0xf8   :  { %v523_v40 = vpop.f32.mrf.mxu0  ;;  %v1201_v41 = vmax.f32 %v471_v39, 0.0 }
  0xf9   :  { %v591_v42 = vpop.f32.mrf.mxu1  ;;  %v1339_v44 = vadd.f32 %v1193_v38, %v1192_v37  ;;  %v1202_v47 = vmax.f32 %v523_v40, 0.0 }
  0xfa   :  { %v525_v45 = vpop.f32.mrf.mxu0  ;;  %v1210_v51 = vmax.f32 %v591_v42, 0.0  ;;  %v1351_v54 = vadd.f32 %v1201_v41, %v1200_v46 }
  0xfb   :  { %v1203_v48 = vmax.f32 %v525_v45, 0.0  ;;  %v593_v49 = vpop.f32.mrf.mxu1  ;;  %1349 = vadd.xlane.f32.xlu0 %v1348_v43  ;;  %1340 = vadd.xlane.f32.xlu1 %v1339_v44 }
  0xfc   :  { %v527_v50 = vpop.f32.mrf.mxu0  ;;  %v1211_v52 = vmax.f32 %v593_v49, 0.0 }
  0xfd   :  { %v595_v53 = vpop.f32.mrf.mxu1  ;;  %v1354_v55 = vadd.f32 %v1203_v48, %v1202_v47  ;;  %v1204_v57 = vmax.f32 %v527_v50, 0.0 }
  0xfe   :  { %v529_v56 = vpop.f32.mrf.mxu0  ;;  %v1366_v63 = vadd.f32 %v1211_v52, %v1210_v51  ;;  %v1212_v2 = vmax.f32 %v595_v53, 0.0 }
  0xff   :  { %v1205_v58 = vmax.f32 %v529_v56, 0.0  ;;  %v597_v59 = vpop.f32.mrf.mxu1  ;;  %1352 = vadd.xlane.f32.xlu1 %v1351_v54  ;;  %1355 = vadd.xlane.f32.xlu0 %v1354_v55 }
 0x100   :  { %v533_v60 = vpop.f32.mrf.mxu0  ;;  %v1213_v61 = vmax.f32 %v597_v59, 0.0 }
 0x101   :  { %v601_v62 = vpop.f32.mrf.mxu1  ;;  %v1357_v0 = vadd.f32 %v1205_v58, %v1204_v57  ;;  %v1206_v3 = vmax.f32 %v533_v60, 0.0 }
 0x102   :  { %v535_v1 = vpop.f32.mrf.mxu0  ;;  %v1214_v8 = vmax.f32 %v601_v62, 0.0  ;;  %v1369_v11 = vadd.f32 %v1213_v61, %v1212_v2 }
 0x103   :  { %v1207_v5 = vmax.f32 %v535_v1, 0.0  ;;  %v603_v6 = vpop.f32.mrf.mxu1  ;;  %1367 = vadd.xlane.f32.xlu0 %v1366_v63  ;;  %1358 = vadd.xlane.f32.xlu1 %v1357_v0 }
 0x104   :  { %v537_v7 = vpop.f32.mrf.mxu0  ;;  %v1215_v9 = vmax.f32 %v603_v6, 0.0 }
 0x105   :  { %v605_v10 = vpop.f32.mrf.mxu1  ;;  %v1360_v12 = vadd.f32 %v1207_v5, %v1206_v3  ;;  %v1208_v14 = vmax.f32 %v537_v7, 0.0 }
 0x106   :  { %v539_v13 = vpop.f32.mrf.mxu0  ;;  %v1372_v20 = vadd.f32 %v1215_v9, %v1214_v8  ;;  %v1216_v23 = vmax.f32 %v605_v10, 0.0 }
 0x107   :  { %v1209_v15 = vmax.f32 %v539_v13, 0.0  ;;  %v607_v16 = vpop.f32.mrf.mxu1  ;;  %1370 = vadd.xlane.f32.xlu1 %v1369_v11  ;;  %1361 = vadd.xlane.f32.xlu0 %v1360_v12 }
 0x108   :  { %v659_v17 = vpop.f32.mrf.mxu0  ;;  %v1217_v18 = vmax.f32 %v607_v16, 0.0 }
 0x109   :  { %v727_v19 = vpop.f32.mrf.mxu1  ;;  %v1363_v21 = vadd.f32 %v1209_v15, %v1208_v14  ;;  %v1218_v24 = vmax.f32 %v659_v17, 0.0 }
 0x10a   :  { %v661_v22 = vpop.f32.mrf.mxu0  ;;  %v1226_v28 = vmax.f32 %v727_v19, 0.0  ;;  %v1375_v31 = vadd.f32 %v1217_v18, %v1216_v23 }
 0x10b   :  { %v1219_v25 = vmax.f32 %v661_v22, 0.0  ;;  %v729_v26 = vpop.f32.mrf.mxu1  ;;  %1373 = vadd.xlane.f32.xlu0 %v1372_v20  ;;  %1364 = vadd.xlane.f32.xlu1 %v1363_v21 }
 0x10c   :  { %v663_v27 = vpop.f32.mrf.mxu0  ;;  %v1227_v29 = vmax.f32 %v729_v26, 0.0 }
 0x10d   :  { %v731_v30 = vpop.f32.mrf.mxu1  ;;  %v1378_v32 = vadd.f32 %v1219_v25, %v1218_v24  ;;  %v1220_v34 = vmax.f32 %v663_v27, 0.0 }
 0x10e   :  { %v665_v33 = vpop.f32.mrf.mxu0  ;;  %v1390_v40 = vadd.f32 %v1227_v29, %v1226_v28  ;;  %v1228_v43 = vmax.f32 %v731_v30, 0.0 }
 0x10f   :  { %v1221_v35 = vmax.f32 %v665_v33, 0.0  ;;  %v733_v36 = vpop.f32.mrf.mxu1  ;;  %1376 = vadd.xlane.f32.xlu1 %v1375_v31  ;;  %1379 = vadd.xlane.f32.xlu0 %v1378_v32 }
 0x110   :  { %v669_v37 = vpop.f32.mrf.mxu0  ;;  %v1229_v38 = vmax.f32 %v733_v36, 0.0 }
 0x111   :  { %v737_v39 = vpop.f32.mrf.mxu1  ;;  %v1381_v41 = vadd.f32 %v1221_v35, %v1220_v34  ;;  %v1222_v44 = vmax.f32 %v669_v37, 0.0 }
 0x112   :  { %v671_v42 = vpop.f32.mrf.mxu0  ;;  %v1230_v48 = vmax.f32 %v737_v39, 0.0  ;;  %v1393_v51 = vadd.f32 %v1229_v38, %v1228_v43 }
 0x113   :  { %v1223_v45 = vmax.f32 %v671_v42, 0.0  ;;  %v739_v46 = vpop.f32.mrf.mxu1  ;;  %1391 = vadd.xlane.f32.xlu0 %v1390_v40  ;;  %1382 = vadd.xlane.f32.xlu1 %v1381_v41 }
 0x114   :  { %v673_v47 = vpop.f32.mrf.mxu0  ;;  %v1231_v49 = vmax.f32 %v739_v46, 0.0 }
 0x115   :  { %v741_v50 = vpop.f32.mrf.mxu1  ;;  %v1384_v52 = vadd.f32 %v1223_v45, %v1222_v44  ;;  %v1224_v54 = vmax.f32 %v673_v47, 0.0 }
 0x116   :  { %v675_v53 = vpop.f32.mrf.mxu0  ;;  %v1396_v60 = vadd.f32 %v1231_v49, %v1230_v48  ;;  %v1232_v63 = vmax.f32 %v741_v50, 0.0 }
 0x117   :  { %v1225_v55 = vmax.f32 %v675_v53, 0.0  ;;  %v743_v56 = vpop.f32.mrf.mxu1  ;;  %1394 = vadd.xlane.f32.xlu1 %v1393_v51  ;;  %1385 = vadd.xlane.f32.xlu0 %v1384_v52 }
 0x118   :  { %v795_v57 = vpop.f32.mrf.mxu0  ;;  %v1233_v58 = vmax.f32 %v743_v56, 0.0 }
 0x119   :  { %v863_v59 = vpop.f32.mrf.mxu1  ;;  %v1387_v61 = vadd.f32 %v1225_v55, %v1224_v54  ;;  %v1234_v0 = vmax.f32 %v795_v57, 0.0 }
 0x11a   :  { %v797_v62 = vpop.f32.mrf.mxu0  ;;  %v1242_v5 = vmax.f32 %v863_v59, 0.0  ;;  %v1399_v8 = vadd.f32 %v1233_v58, %v1232_v63 }
 0x11b   :  { %v1235_v1 = vmax.f32 %v797_v62, 0.0  ;;  %v865_v2 = vpop.f32.mrf.mxu1  ;;  %1397 = vadd.xlane.f32.xlu0 %v1396_v60  ;;  %1388 = vadd.xlane.f32.xlu1 %v1387_v61 }
 0x11c   :  { %v799_v3 = vpop.f32.mrf.mxu0  ;;  %v1243_v6 = vmax.f32 %v865_v2, 0.0 }
 0x11d   :  { %v867_v7 = vpop.f32.mrf.mxu1  ;;  %v1402_v9 = vadd.f32 %v1235_v1, %v1234_v0  ;;  %v1236_v11 = vmax.f32 %v799_v3, 0.0 }
 0x11e   :  { %v801_v10 = vpop.f32.mrf.mxu0  ;;  %v1414_v17 = vadd.f32 %v1243_v6, %v1242_v5  ;;  %v1244_v20 = vmax.f32 %v867_v7, 0.0 }
 0x11f   :  { %v1237_v12 = vmax.f32 %v801_v10, 0.0  ;;  %v869_v13 = vpop.f32.mrf.mxu1  ;;  %1400 = vadd.xlane.f32.xlu1 %v1399_v8  ;;  %1403 = vadd.xlane.f32.xlu0 %v1402_v9 }
 0x120   :  { %v805_v14 = vpop.f32.mrf.mxu0  ;;  %v1245_v15 = vmax.f32 %v869_v13, 0.0 }
 0x121   :  { %v873_v16 = vpop.f32.mrf.mxu1  ;;  %v1405_v18 = vadd.f32 %v1237_v12, %v1236_v11  ;;  %v1238_v21 = vmax.f32 %v805_v14, 0.0 }
 0x122   :  { %v807_v19 = vpop.f32.mrf.mxu0  ;;  %v1246_v25 = vmax.f32 %v873_v16, 0.0  ;;  %v1417_v28 = vadd.f32 %v1245_v15, %v1244_v20 }
 0x123   :  { %v1239_v22 = vmax.f32 %v807_v19, 0.0  ;;  %v875_v23 = vpop.f32.mrf.mxu1  ;;  %1415 = vadd.xlane.f32.xlu0 %v1414_v17  ;;  %1406 = vadd.xlane.f32.xlu1 %v1405_v18 }
 0x124   :  { %v809_v24 = vpop.f32.mrf.mxu0  ;;  %v1247_v26 = vmax.f32 %v875_v23, 0.0 }
 0x125   :  { %v877_v27 = vpop.f32.mrf.mxu1  ;;  %v1408_v29 = vadd.f32 %v1239_v22, %v1238_v21  ;;  %v1240_v31 = vmax.f32 %v809_v24, 0.0 }
 0x126   :  { %v811_v30 = vpop.f32.mrf.mxu0  ;;  %v1420_v37 = vadd.f32 %v1247_v26, %v1246_v25  ;;  %v1248_v40 = vmax.f32 %v877_v27, 0.0 }
 0x127   :  { %v1241_v32 = vmax.f32 %v811_v30, 0.0  ;;  %v879_v33 = vpop.f32.mrf.mxu1  ;;  %1418 = vadd.xlane.f32.xlu1 %v1417_v28  ;;  %1409 = vadd.xlane.f32.xlu0 %v1408_v29 }
 0x128   :  { %v931_v34 = vpop.f32.mrf.mxu0  ;;  %v1249_v35 = vmax.f32 %v879_v33, 0.0 }
 0x129   :  { %v999_v36 = vpop.f32.mrf.mxu1  ;;  %v1411_v38 = vadd.f32 %v1241_v32, %v1240_v31  ;;  %v1250_v41 = vmax.f32 %v931_v34, 0.0 }
 0x12a   :  { %v933_v39 = vpop.f32.mrf.mxu0  ;;  %v1258_v45 = vmax.f32 %v999_v36, 0.0  ;;  %v1423_v48 = vadd.f32 %v1249_v35, %v1248_v40 }
 0x12b   :  { %v1251_v42 = vmax.f32 %v933_v39, 0.0  ;;  %v1001_v43 = vpop.f32.mrf.mxu1  ;;  %1421 = vadd.xlane.f32.xlu0 %v1420_v37  ;;  %1412 = vadd.xlane.f32.xlu1 %v1411_v38 }
 0x12c   :  { %v935_v44 = vpop.f32.mrf.mxu0  ;;  %v1259_v46 = vmax.f32 %v1001_v43, 0.0 }
 0x12d   :  { %v1003_v47 = vpop.f32.mrf.mxu1  ;;  %v1426_v49 = vadd.f32 %v1251_v42, %v1250_v41  ;;  %v1252_v51 = vmax.f32 %v935_v44, 0.0 }
 0x12e   :  { %v937_v50 = vpop.f32.mrf.mxu0  ;;  %v1438_v57 = vadd.f32 %v1259_v46, %v1258_v45  ;;  %v1260_v60 = vmax.f32 %v1003_v47, 0.0 }
 0x12f   :  { %v1253_v52 = vmax.f32 %v937_v50, 0.0  ;;  %v1005_v53 = vpop.f32.mrf.mxu1  ;;  %1424 = vadd.xlane.f32.xlu1 %v1423_v48  ;;  %1427 = vadd.xlane.f32.xlu0 %v1426_v49 }
 0x130   :  { %v941_v54 = vpop.f32.mrf.mxu0  ;;  %v1261_v55 = vmax.f32 %v1005_v53, 0.0 }
 0x131   :  { %v1009_v56 = vpop.f32.mrf.mxu1  ;;  %v1429_v58 = vadd.f32 %v1253_v52, %v1252_v51  ;;  %v1254_v61 = vmax.f32 %v941_v54, 0.0 }
 0x132   :  { %v943_v59 = vpop.f32.mrf.mxu0  ;;  %v1262_v1 = vmax.f32 %v1009_v56, 0.0  ;;  %v1441_v5 = vadd.f32 %v1261_v55, %v1260_v60 }
 0x133   :  { %v1255_v62 = vmax.f32 %v943_v59, 0.0  ;;  %v1011_v63 = vpop.f32.mrf.mxu1  ;;  %1439 = vadd.xlane.f32.xlu0 %v1438_v57  ;;  %1430 = vadd.xlane.f32.xlu1 %v1429_v58  ;;  %v1671_v57 = vlaneseq }
 0x134   :  { %v945_v0 = vpop.f32.mrf.mxu0  ;;  %v1263_v2 = vmax.f32 %v1011_v63, 0.0 }
 0x135   :  { %v1013_v3 = vpop.f32.mrf.mxu1  ;;  %v1432_v6 = vadd.f32 %v1255_v62, %v1254_v61  ;;  %v1256_v8 = vmax.f32 %v945_v0, 0.0  ;;  %v3069_v59 = vand.u32 127, %v1671_v57  ;;  %v2778_v0 = vld [vmem:[%s3328_s2 + $0x14] ss:$8 sps:$4 sm:$0xff]  }
 0x136   :  { %v947_v7 = vpop.f32.mrf.mxu0  ;;  %v1444_v14 = vadd.f32 %v1263_v2, %v1262_v1  ;;  %v1264_v17 = vmax.f32 %v1013_v3, 0.0  ;;  %v2776_v3 = vld [vmem:[%s3328_s2 + $0x10] ss:$8 sps:$4 sm:$0xff]   ;;  %2041 = vmatprep.subr.bf16.mxu0 %v2778_v0 }
 0x137   :  { %v1257_v9 = vmax.f32 %v947_v7, 0.0  ;;  %v1015_v10 = vpop.f32.mrf.mxu1  ;;  %1442 = vadd.xlane.f32.xlu1 %v1441_v5  ;;  %1433 = vadd.xlane.f32.xlu0 %v1432_v6  ;;  %v3077_v6 = vshrl.u32 %v1671_v57, 7  ;;  %v1677_v7 = vadd.s32 4294967288, %v3069_v59  ;;  %vm2494_vm13 = vcmp.lt.s32.totalorder %v3069_v59, 100 }
 0x138   :  { %v1067_v11 = vpop.f32.mrf.mxu0  ;;  %v1265_v12 = vmax.f32 %v1015_v10, 0.0  ;;  %2042 = vmatpush1.bf16.msra.mxu0 %v2776_v3  ;;  %v2781_v10 = vld [vmem:[%s3328_s2 + $0x4] ss:$8 sps:$4 sm:$0xff]  }
 0x139   :  { %v1135_v13 = vpop.f32.mrf.mxu1  ;;  %v1435_v15 = vadd.f32 %v1257_v9, %v1256_v8  ;;  %v1266_v18 = vmax.f32 %v1067_v11, 0.0  ;;  %v2779_v11 = vld [vmem:[%s3328_s2] ss:$8 sps:$4 sm:$0xff]   ;;  %2043 = vmatprep.subr.bf16.mxu0 %v2781_v10  ;;  %vm2371_vm1 = vcmp.eq.s32.totalorder %v3077_v6, %v3069_v59 }
 0x13a   :  { %v1069_v16 = vpop.f32.mrf.mxu0  ;;  %v1274_v22 = vmax.f32 %v1135_v13, 0.0  ;;  %v1447_v25 = vadd.f32 %v1265_v12, %v1264_v17  ;;  %v1684_v12 = vadd.s32 4294967280, %v3069_v59  ;;  %v1691_v13 = vadd.s32 4294967272, %v3069_v59 }
 0x13b   :  { %v1267_v19 = vmax.f32 %v1069_v16, 0.0  ;;  %v1137_v20 = vpop.f32.mrf.mxu1  ;;  %1445 = vadd.xlane.f32.xlu0 %v1444_v14  ;;  %1436 = vadd.xlane.f32.xlu1 %v1435_v15  ;;  %v3090_v14 = vsub.s32 %v3069_v59, %v3077_v6  ;;  %v3093_v15 = vsub.s32 %v1677_v7, %v3077_v6 }
 0x13c   :  { %v1071_v21 = vpop.f32.mrf.mxu0  ;;  %v1275_v23 = vmax.f32 %v1137_v20, 0.0  ;;  %2044 = vmatpush1.bf16.msra.mxu0 %v2779_v11 }
 0x13d   :  { %v1139_v24 = vpop.f32.mrf.mxu1  ;;  %v1450_v26 = vadd.f32 %v1267_v19, %v1266_v18  ;;  %v1268_v28 = vmax.f32 %v1071_v21, 0.0 }
 0x13e   :  { %v1073_v27 = vpop.f32.mrf.mxu0  ;;  %v1462_v34 = vadd.f32 %v1275_v23, %v1274_v22  ;;  %v1276_v37 = vmax.f32 %v1139_v24, 0.0  ;;  %v3096_v22 = vsub.s32 %v1684_v12, %v3077_v6  ;;  %v3099_v23 = vsub.s32 %v1691_v13, %v3077_v6 }
 0x13f   :  { %v1269_v29 = vmax.f32 %v1073_v27, 0.0  ;;  %v1141_v30 = vpop.f32.mrf.mxu1  ;;  %1448 = vadd.xlane.f32.xlu1 %v1447_v25  ;;  %1451 = vadd.xlane.f32.xlu0 %v1450_v26 }
 0x140   :  { %v1077_v31 = vpop.f32.mrf.mxu0  ;;  %v1277_v32 = vmax.f32 %v1141_v30, 0.0 }
 0x141   :  { %v1145_v33 = vpop.f32.mrf.mxu1  ;;  %v1453_v35 = vadd.f32 %v1269_v29, %v1268_v28  ;;  %v1270_v38 = vmax.f32 %v1077_v31, 0.0 }
 0x142   :  { %v1079_v36 = vpop.f32.mrf.mxu0  ;;  %v1278_v42 = vmax.f32 %v1145_v33, 0.0  ;;  %v1465_v45 = vadd.f32 %v1277_v32, %v1276_v37 }
 0x143   :  { %v1271_v39 = vmax.f32 %v1079_v36, 0.0  ;;  %v1147_v40 = vpop.f32.mrf.mxu1  ;;  %1463 = vadd.xlane.f32.xlu0 %v1462_v34  ;;  %1454 = vadd.xlane.f32.xlu1 %v1453_v35 }
 0x144   :  { %v1081_v41 = vpop.f32.mrf.mxu0  ;;  %v1279_v43 = vmax.f32 %v1147_v40, 0.0 }
 0x145   :  { %v1149_v44 = vpop.f32.mrf.mxu1  ;;  %v1456_v46 = vadd.f32 %v1271_v39, %v1270_v38  ;;  %v1272_v48 = vmax.f32 %v1081_v41, 0.0 }
 0x146   :  { %v1083_v47 = vpop.f32.mrf.mxu0  ;;  %v1468_v52 = vadd.f32 %v1279_v43, %v1278_v42  ;;  %v1280_v54 = vmax.f32 %v1149_v44, 0.0 }
 0x147   :  { %v1273_v49 = vmax.f32 %v1083_v47, 0.0  ;;  %v1151_v50 = vpop.f32.mrf.mxu1  ;;  %1466 = vadd.xlane.f32.xlu1 %v1465_v45  ;;  %1457 = vadd.xlane.f32.xlu0 %v1456_v46 }
 0x148   :  { %v1281_v51 = vmax.f32 %v1151_v50, 0.0 }
 0x149   :  { %v1459_v53 = vadd.f32 %v1273_v49, %v1272_v48 }
 0x14a   :  { %v1471_v55 = vadd.f32 %v1281_v51, %v1280_v54 }
 0x14b   :  { %1469 = vadd.xlane.f32.xlu0 %v1468_v52  ;;  %1460 = vadd.xlane.f32.xlu1 %v1459_v53 }
 0x14f   :  { %1472 = vadd.xlane.f32.xlu1 %v1471_v55 }
 0x158   :  { %v1284_v56 = vpop.xlane.xlu0 %1283 }
 0x159   :  { %v1296_v58 = vpop.xlane.xlu1 %1295  ;;  %v1475_v61 = vmul.f32 0.00390625, %v1284_v56 }
 0x15a   :  { %v1479_v1 = vmul.f32 0.00390625, %v1296_v58 }
 0x15c   :  { %v1287_v60 = vpop.xlane.xlu0 %1286 }
 0x15d   :  { %v1299_v62 = vpop.xlane.xlu1 %1298  ;;  %v1476_v63 = vmul.f32 0.00390625, %v1287_v60 }
 0x15e   :  { %v1480_v2 = vmul.f32 0.00390625, %v1299_v62 }
 0x15f   :  { %v1539_v5 = vpack.c.bf16 %v1476_v63, %v1475_v61 }
 0x160   :  { %v1541_v8 = vpack.c.bf16 %v1480_v2, %v1479_v1  ;;  %v1290_v9 = vpop.xlane.xlu0 %1289 }
 0x161   :  { %v1607_v16 = vunpack.c.l.b16 %v1539_v5  ;;  %v1608_v17 = vunpack.c.h.b16 %v1539_v5  ;;  %v1477_v20 = vmul.f32 0.00390625, %v1290_v9 }
 0x162   :  { %v1611_v25 = vunpack.c.l.b16 %v1541_v8  ;;  %v1612_v26 = vunpack.c.h.b16 %v1541_v8 }
 0x163   :  { %v1676_v27 = vrot.slane %v1607_v16, %v3090_v14  ;;  %v1681_v28 = vrot.slane %v1608_v17, %v3093_v15 }
 0x164   :  { %v1302_v18 = vpop.xlane.xlu0 %1301  ;;  %v1293_v19 = vpop.xlane.xlu1 %1292  ;;  %v1701_v38 = vrot.slane %v1611_v25, %v3090_v14  ;;  %v1705_v39 = vrot.slane %v1612_v26, %v3093_v15 }
 0x165   :  { %v1478_v21 = vmul.f32 0.00390625, %v1293_v19  ;;  %v1481_v31 = vmul.f32 0.00390625, %v1302_v18  ;;  %v1683_v40 = vsel %vm1682_vm2, %v1681_v28, %v1676_v27 }
 0x166   :  { %v1706_v51 = vsel %vm1682_vm2, %v1705_v39, %v1701_v38 }
 0x167   :  { %v1540_v24 = vpack.c.bf16 %v1478_v21, %v1477_v20 }
 0x168   :  { %v1305_v29 = vpop.xlane.xlu1 %1304  ;;  %v1308_v30 = vpop.xlane.xlu0 %1307 }
 0x169   :  { %v1609_v32 = vunpack.c.l.b16 %v1540_v24  ;;  %v1610_v33 = vunpack.c.h.b16 %v1540_v24  ;;  %v1482_v34 = vmul.f32 0.00390625, %v1305_v29  ;;  %v1483_v47 = vmul.f32 0.00390625, %v1308_v30 }
 0x16b   :  { %v1688_v35 = vrot.slane %v1609_v32, %v3096_v22  ;;  %v1695_v36 = vrot.slane %v1610_v33, %v3099_v23  ;;  %v1542_v37 = vpack.c.bf16 %v1482_v34, %v1481_v31 }
 0x16c   :  { %v1320_v41 = vpop.xlane.xlu0 %1319  ;;  %v1311_v42 = vpop.xlane.xlu1 %1310 }
 0x16d   :  { %v1690_v43 = vsel %vm1689_vm3, %v1688_v35, %v1683_v40  ;;  %v1613_v44 = vunpack.c.l.b16 %v1542_v37  ;;  %v1614_v45 = vunpack.c.h.b16 %v1542_v37  ;;  %v1484_v48 = vmul.f32 0.00390625, %v1311_v42 }
 0x16e   :  { %v1697_v46 = vsel %vm1696_vm4, %v1695_v36, %v1690_v43  ;;  %v1487_v56 = vmul.f32 0.00390625, %v1320_v41 }
 0x16f   :  { %v1710_v49 = vrot.slane %v1613_v44, %v3096_v22  ;;  %v1715_v50 = vrot.slane %v1614_v45, %v3099_v23  ;;  %v1543_v52 = vpack.c.bf16 %v1484_v48, %v1483_v47 }
 0x170   :  { %v1323_v53 = vpop.xlane.xlu1 %1322  ;;  %v1314_v54 = vpop.xlane.xlu0 %1313 }
 0x171   :  { %v1711_v55 = vsel %vm1689_vm3, %v1710_v49, %v1706_v51  ;;  %v1488_v57 = vmul.f32 0.00390625, %v1323_v53  ;;  %v1615_v62 = vunpack.c.l.b16 %v1543_v52  ;;  %v1616_v63 = vunpack.c.h.b16 %v1543_v52 }
 0x172   :  { %v1716_v58 = vsel %vm1696_vm4, %v1715_v50, %v1711_v55  ;;  %v1485_v2 = vmul.f32 0.00390625, %v1314_v54 }
 0x173   :  { %v1984_v60 = vsel %vm1983_vm5, %v1716_v58, %v1697_v46  ;;  %v1545_v61 = vpack.c.bf16 %v1488_v57, %v1487_v56  ;;  %v1720_v7 = vrot.slane %v1615_v62, %v3090_v14  ;;  %v1724_v8 = vrot.slane %v1616_v63, %v3093_v15 }
 0x174   :  { %v1326_v0 = vpop.xlane.xlu0 %1325  ;;  %v1317_v1 = vpop.xlane.xlu1 %1316 }
 0x175   :  { %v1486_v3 = vmul.f32 0.00390625, %v1317_v1  ;;  %v1619_v9 = vunpack.c.l.b16 %v1545_v61  ;;  %v1620_v10 = vunpack.c.h.b16 %v1545_v61  ;;  %v1489_v13 = vmul.f32 0.00390625, %v1326_v0 }
 0x176   :  { %v1725_v24 = vsel %vm1682_vm2, %v1724_v8, %v1720_v7 }
 0x177   :  { %v1544_v5 = vpack.c.bf16 %v1486_v3, %v1485_v2  ;;  %v1739_v25 = vrot.slane %v1619_v9, %v3090_v14  ;;  %v1743_v26 = vrot.slane %v1620_v10, %v3093_v15 }
 0x178   :  { %v1329_v11 = vpop.xlane.xlu1 %1328  ;;  %v1332_v12 = vpop.xlane.xlu0 %1331 }
 0x179   :  { %v1617_v16 = vunpack.c.l.b16 %v1544_v5  ;;  %v1618_v17 = vunpack.c.h.b16 %v1544_v5  ;;  %v1490_v18 = vmul.f32 0.00390625, %v1329_v11  ;;  %v1491_v33 = vmul.f32 0.00390625, %v1332_v12 }
 0x17a   :  { %v1744_v38 = vsel %vm1682_vm2, %v1743_v26, %v1739_v25 }
 0x17b   :  { %v1729_v19 = vrot.slane %v1617_v16, %v3096_v22  ;;  %v1734_v20 = vrot.slane %v1618_v17, %v3099_v23  ;;  %v1546_v21 = vpack.c.bf16 %v1490_v18, %v1489_v13 }
 0x17c   :  { %v1344_v27 = vpop.xlane.xlu0 %1343  ;;  %v1335_v28 = vpop.xlane.xlu1 %1334 }
 0x17d   :  { %v1730_v29 = vsel %vm1689_vm3, %v1729_v19, %v1725_v24  ;;  %v1621_v30 = vunpack.c.l.b16 %v1546_v21  ;;  %v1622_v31 = vunpack.c.h.b16 %v1546_v21  ;;  %v1492_v34 = vmul.f32 0.00390625, %v1335_v28 }
 0x17e   :  { %v1735_v32 = vsel %vm1696_vm4, %v1734_v20, %v1730_v29  ;;  %v1495_v43 = vmul.f32 0.00390625, %v1344_v27 }
 0x17f   :  { %v1986_v35 = vsel %vm1985_vm6, %v1735_v32, %v1984_v60  ;;  %v1748_v36 = vrot.slane %v1621_v30, %v3096_v22  ;;  %v1753_v37 = vrot.slane %v1622_v31, %v3099_v23  ;;  %v1547_v39 = vpack.c.bf16 %v1492_v34, %v1491_v33 }
 0x180   :  { %v1347_v40 = vpop.xlane.xlu1 %1346  ;;  %v1338_v41 = vpop.xlane.xlu0 %1337 }
 0x181   :  { %v1749_v42 = vsel %vm1689_vm3, %v1748_v36, %v1744_v38  ;;  %v1496_v44 = vmul.f32 0.00390625, %v1347_v40  ;;  %v1623_v48 = vunpack.c.l.b16 %v1547_v39  ;;  %v1624_v49 = vunpack.c.h.b16 %v1547_v39 }
 0x182   :  { %v1754_v45 = vsel %vm1696_vm4, %v1753_v37, %v1749_v42  ;;  %v1493_v52 = vmul.f32 0.00390625, %v1338_v41 }
 0x183   :  { %v1988_v46 = vsel %vm1987_vm7, %v1754_v45, %v1986_v35  ;;  %v1549_v47 = vpack.c.bf16 %v1496_v44, %v1495_v43  ;;  %v1758_v55 = vrot.slane %v1623_v48, %v3090_v14  ;;  %v1762_v56 = vrot.slane %v1624_v49, %v3093_v15 }
 0x184   :  { %v1350_v50 = vpop.xlane.xlu0 %1349  ;;  %v1341_v51 = vpop.xlane.xlu1 %1340 }
 0x185   :  { %v1494_v53 = vmul.f32 0.00390625, %v1341_v51  ;;  %v1627_v57 = vunpack.c.l.b16 %v1549_v47  ;;  %v1628_v58 = vunpack.c.h.b16 %v1549_v47  ;;  %v1497_v62 = vmul.f32 0.00390625, %v1350_v50 }
 0x186   :  { %v1763_v7 = vsel %vm1682_vm2, %v1762_v56, %v1758_v55 }
 0x187   :  { %v1548_v54 = vpack.c.bf16 %v1494_v53, %v1493_v52  ;;  %v1777_v8 = vrot.slane %v1627_v57, %v3090_v14  ;;  %v1781_v9 = vrot.slane %v1628_v58, %v3093_v15 }
 0x188   :  { %v1353_v60 = vpop.xlane.xlu1 %1352  ;;  %v1356_v61 = vpop.xlane.xlu0 %1355 }
 0x189   :  { %v1625_v63 = vunpack.c.l.b16 %v1548_v54  ;;  %v1626_v0 = vunpack.c.h.b16 %v1548_v54  ;;  %v1498_v1 = vmul.f32 0.00390625, %v1353_v60  ;;  %v1499_v18 = vmul.f32 0.00390625, %v1356_v61 }
 0x18a   :  { %v1782_v25 = vsel %vm1682_vm2, %v1781_v9, %v1777_v8 }
 0x18b   :  { %v1767_v2 = vrot.slane %v1625_v63, %v3096_v22  ;;  %v1772_v3 = vrot.slane %v1626_v0, %v3099_v23  ;;  %v1550_v5 = vpack.c.bf16 %v1498_v1, %v1497_v62 }
 0x18c   :  { %v1368_v10 = vpop.xlane.xlu0 %1367  ;;  %v1359_v11 = vpop.xlane.xlu1 %1358 }
 0x18d   :  { %v1768_v12 = vsel %vm1689_vm3, %v1767_v2, %v1763_v7  ;;  %v1629_v13 = vunpack.c.l.b16 %v1550_v5  ;;  %v1630_v16 = vunpack.c.h.b16 %v1550_v5  ;;  %v1500_v19 = vmul.f32 0.00390625, %v1359_v11 }
 0x18e   :  { %v1773_v17 = vsel %vm1696_vm4, %v1772_v3, %v1768_v12  ;;  %v1503_v30 = vmul.f32 0.00390625, %v1368_v10 }
 0x18f   :  { %v1990_v20 = vsel %vm1989_vm8, %v1773_v17, %v1988_v46  ;;  %v1786_v21 = vrot.slane %v1629_v13, %v3096_v22  ;;  %v1791_v24 = vrot.slane %v1630_v16, %v3099_v23  ;;  %v1551_v26 = vpack.c.bf16 %v1500_v19, %v1499_v18 }
 0x190   :  { %v1371_v27 = vpop.xlane.xlu1 %1370  ;;  %v1362_v28 = vpop.xlane.xlu0 %1361 }
 0x191   :  { %v1787_v29 = vsel %vm1689_vm3, %v1786_v21, %v1782_v25  ;;  %v1504_v31 = vmul.f32 0.00390625, %v1371_v27  ;;  %v1631_v35 = vunpack.c.l.b16 %v1551_v26  ;;  %v1632_v36 = vunpack.c.h.b16 %v1551_v26 }
 0x192   :  { %v1792_v32 = vsel %vm1696_vm4, %v1791_v24, %v1787_v29  ;;  %v1501_v39 = vmul.f32 0.00390625, %v1362_v28 }
 0x193   :  { %v1992_v33 = vsel %vm1991_vm9, %v1792_v32, %v1990_v20  ;;  %v1553_v34 = vpack.c.bf16 %v1504_v31, %v1503_v30  ;;  %v1796_v42 = vrot.slane %v1631_v35, %v3090_v14  ;;  %v1800_v43 = vrot.slane %v1632_v36, %v3093_v15 }
 0x194   :  { %v1374_v37 = vpop.xlane.xlu0 %1373  ;;  %v1365_v38 = vpop.xlane.xlu1 %1364 }
 0x195   :  { %v1502_v40 = vmul.f32 0.00390625, %v1365_v38  ;;  %v1635_v44 = vunpack.c.l.b16 %v1553_v34  ;;  %v1636_v45 = vunpack.c.h.b16 %v1553_v34  ;;  %v1505_v48 = vmul.f32 0.00390625, %v1374_v37 }
 0x196   :  { %v1801_v55 = vsel %vm1682_vm2, %v1800_v43, %v1796_v42 }
 0x197   :  { %v1552_v41 = vpack.c.bf16 %v1502_v40, %v1501_v39  ;;  %v1815_v56 = vrot.slane %v1635_v44, %v3090_v14  ;;  %v1819_v57 = vrot.slane %v1636_v45, %v3093_v15 }
 0x198   :  { %v1377_v46 = vpop.xlane.xlu1 %1376  ;;  %v1380_v47 = vpop.xlane.xlu0 %1379 }
 0x199   :  { %v1633_v49 = vunpack.c.l.b16 %v1552_v41  ;;  %v1634_v50 = vunpack.c.h.b16 %v1552_v41  ;;  %v1506_v51 = vmul.f32 0.00390625, %v1377_v46  ;;  %v1820_v5 = vsel %vm1682_vm2, %v1819_v57, %v1815_v56 }
 0x19a   :  { %v1507_v35 = vmul.f32 0.00390625, %v1380_v47 }
 0x19b   :  { %v1805_v52 = vrot.slane %v1633_v49, %v3096_v22  ;;  %v1810_v53 = vrot.slane %v1634_v50, %v3099_v23  ;;  %v1554_v54 = vpack.c.bf16 %v1506_v51, %v1505_v48 }
 0x19c   :  { %v1392_v58 = vpop.xlane.xlu0 %1391  ;;  %v1383_v60 = vpop.xlane.xlu1 %1382 }
 0x19d   :  { %v1806_v61 = vsel %vm1689_vm3, %v1805_v52, %v1801_v55  ;;  %v1637_v62 = vunpack.c.l.b16 %v1554_v54  ;;  %v1638_v63 = vunpack.c.h.b16 %v1554_v54  ;;  %v1511_v28 = vmul.f32 0.00390625, %v1392_v58 }
 0x19e   :  { %v1811_v0 = vsel %vm1696_vm4, %v1810_v53, %v1806_v61  ;;  %v1508_v29 = vmul.f32 0.00390625, %v1383_v60 }
 0x19f   :  { %v1994_v1 = vsel %vm1993_vm10, %v1811_v0, %v1992_v33  ;;  %v1824_v2 = vrot.slane %v1637_v62, %v3096_v22  ;;  %v1829_v3 = vrot.slane %v1638_v63, %v3099_v23 }
 0x1a0   :  { %v1395_v7 = vpop.xlane.xlu1 %1394  ;;  %v1386_v8 = vpop.xlane.xlu0 %1385  ;;  %v1555_v38 = vpack.c.bf16 %v1508_v29, %v1507_v35 }
 0x1a1   :  { %v1825_v9 = vsel %vm1689_vm3, %v1824_v2, %v1820_v5  ;;  %v1512_v26 = vmul.f32 0.00390625, %v1395_v7  ;;  %v1509_v37 = vmul.f32 0.00390625, %v1386_v8 }
 0x1a2   :  { %v1830_v10 = vsel %vm1696_vm4, %v1829_v3, %v1825_v9  ;;  %v1639_v48 = vunpack.c.l.b16 %v1555_v38  ;;  %v1640_v49 = vunpack.c.h.b16 %v1555_v38 }
 0x1a3   :  { %v3164_v11 = vsel %vm1995_vm11, %v1830_v10, %v1994_v1  ;;  %v1557_v33 = vpack.c.bf16 %v1512_v26, %v1511_v28 }
 0x1a4   :  { %v1398_v12 = vpop.xlane.xlu0 %1397  ;;  %v1389_v13 = vpop.xlane.xlu1 %1388  ;;  %v1834_v61 = vrot.slane %v1639_v48, %v3090_v14  ;;  %v1838_v62 = vrot.slane %v1640_v49, %v3093_v15 }
 0x1a5   :  { %v1513_v30 = vmul.f32 0.00390625, %v1398_v12  ;;  %v1510_v34 = vmul.f32 0.00390625, %v1389_v13  ;;  %v1643_v41 = vunpack.c.l.b16 %v1557_v33  ;;  %v1644_v42 = vunpack.c.h.b16 %v1557_v33 }
 0x1a7   :  { %v1556_v43 = vpack.c.bf16 %v1510_v34, %v1509_v37  ;;  %v1853_v53 = vrot.slane %v1643_v41, %v3090_v14  ;;  %v1857_v47 = vrot.slane %v1644_v42, %v3093_v15 }
 0x1a8   :  { %v1401_v16 = vpop.xlane.xlu1 %1400  ;;  %v1404_v17 = vpop.xlane.xlu0 %1403 }
 0x1a9   :  { %v1514_v27 = vmul.f32 0.00390625, %v1401_v16  ;;  %v1515_v50 = vmul.f32 0.00390625, %v1404_v17  ;;  %v1641_v54 = vunpack.c.l.b16 %v1556_v43  ;;  %v1858_v2 = vsel %vm1682_vm2, %v1857_v47, %v1853_v53 }
 0x1aa   :  { %v1642_v3 = vunpack.c.h.b16 %v1556_v43 }
 0x1ab   :  { %v1558_v36 = vpack.c.bf16 %v1514_v27, %v1513_v30  ;;  %v1843_v5 = vrot.slane %v1641_v54, %v3096_v22 }
 0x1ac   :  { %v1416_v18 = vpop.xlane.xlu0 %1415  ;;  %v1407_v19 = vpop.xlane.xlu1 %1406  ;;  %v1848_v29 = vrot.slane %v1642_v3, %v3099_v23 }
 0x1ad   :  { %v1645_v44 = vunpack.c.l.b16 %v1558_v36  ;;  %v1516_v45 = vmul.f32 0.00390625, %v1407_v19  ;;  %v1519_v55 = vmul.f32 0.00390625, %v1416_v18  ;;  %v1646_v56 = vunpack.c.h.b16 %v1558_v36 }
 0x1ae   :  { %v1839_v19 = vsel %vm1682_vm2, %v1838_v62, %v1834_v61 }
 0x1af   :  { %v1862_v57 = vrot.slane %v1645_v44, %v3096_v22  ;;  %v1559_v58 = vpack.c.bf16 %v1516_v45, %v1515_v50  ;;  %v1867_v9 = vrot.slane %v1646_v56, %v3099_v23  ;;  %v1844_v28 = vsel %vm1689_vm3, %v1843_v5, %v1839_v19 }
 0x1b0   :  { %v1419_v20 = vpop.xlane.xlu1 %1418  ;;  %v1410_v21 = vpop.xlane.xlu0 %1409 }
 0x1b1   :  { %v1520_v46 = vmul.f32 0.00390625, %v1419_v20  ;;  %v1863_v8 = vsel %vm1689_vm3, %v1862_v57, %v1858_v2  ;;  %v1647_v10 = vunpack.c.l.b16 %v1559_v58  ;;  %v1517_v12 = vmul.f32 0.00390625, %v1410_v21 }
 0x1b2   :  { %v1648_v13 = vunpack.c.h.b16 %v1559_v58  ;;  %v1868_v33 = vsel %vm1696_vm4, %v1867_v9, %v1863_v8 }
 0x1b3   :  { %v1561_v60 = vpack.c.bf16 %v1520_v46, %v1519_v55  ;;  %v1872_v21 = vrot.slane %v1647_v10, %v3090_v14 }
 0x1b4   :  { %v1422_v24 = vpop.xlane.xlu0 %1421  ;;  %v1413_v25 = vpop.xlane.xlu1 %1412 }
 0x1b5   :  { %v1518_v63 = vmul.f32 0.00390625, %v1413_v25  ;;  %v1651_v16 = vunpack.c.l.b16 %v1561_v60  ;;  %v1521_v17 = vmul.f32 0.00390625, %v1422_v24  ;;  %v1652_v20 = vunpack.c.h.b16 %v1561_v60 }
 0x1b6   :  { %v1876_v24 = vrot.slane %v1648_v13, %v3093_v15 }
 0x1b7   :  { %v1560_v25 = vpack.c.bf16 %v1518_v63, %v1517_v12  ;;  %v1891_v36 = vrot.slane %v1651_v16, %v3090_v14 }
 0x1b8   :  { %v1425_v31 = vpop.xlane.xlu1 %1424  ;;  %v1428_v32 = vpop.xlane.xlu0 %1427 }
 0x1b9   :  { %v1522_v7 = vmul.f32 0.00390625, %v1425_v31  ;;  %v1523_v31 = vmul.f32 0.00390625, %v1428_v32  ;;  %v1649_v41 = vunpack.c.l.b16 %v1560_v25  ;;  %v1849_v32 = vsel %vm1696_vm4, %v1848_v29, %v1844_v28 }
 0x1ba   :  { %v1650_v46 = vunpack.c.h.b16 %v1560_v25  ;;  %v3185_v54 = vsel %vm1983_vm5, %v1868_v33, %v1849_v32 }
 0x1bb   :  { %v1562_v30 = vpack.c.bf16 %v1522_v7, %v1521_v17  ;;  %v1881_v58 = vrot.slane %v1649_v41, %v3096_v22 }
 0x1bc   :  { %v1440_v39 = vpop.xlane.xlu0 %1439  ;;  %v1431_v40 = vpop.xlane.xlu1 %1430  ;;  %v1886_v63 = vrot.slane %v1650_v46, %v3099_v23 }
 0x1bd   :  { %v1524_v18 = vmul.f32 0.00390625, %v1431_v40  ;;  %v1895_v40 = vrot.slane %v1652_v20, %v3093_v15  ;;  %v1527_v42 = vmul.f32 0.00390625, %v1440_v39  ;;  %v1653_v48 = vunpack.c.l.b16 %v1562_v30 }
 0x1be   :  { %v1877_v39 = vsel %vm1682_vm2, %v1876_v24, %v1872_v21 }
 0x1bf   :  { %v1563_v37 = vpack.c.bf16 %v1524_v18, %v1523_v31  ;;  %v1882_v16 = vsel %vm1689_vm3, %v1881_v58, %v1877_v39 }
 0x1c0   :  { %v1443_v51 = vpop.xlane.xlu1 %1442  ;;  %v1434_v52 = vpop.xlane.xlu0 %1433  ;;  %v1887_v46 = vsel %vm1696_vm4, %v1886_v63, %v1882_v16 }
 0x1c1   :  { %v1528_v34 = vmul.f32 0.00390625, %v1443_v51  ;;  %v1525_v43 = vmul.f32 0.00390625, %v1434_v52  ;;  %v1655_v55 = vunpack.c.l.b16 %v1563_v37  ;;  %v1656_v56 = vunpack.c.h.b16 %v1563_v37 }
 0x1c2   :  { %v1896_v52 = vsel %vm1682_vm2, %v1895_v40, %v1891_v36  ;;  %v1998_v63 = vsel %vm1985_vm6, %v1887_v46, %v3185_v54  ;;  %v2493_v46 = vld [vmem:[%s3329_s3 + $0x8] sm:$0xff] }
 0x1c3   :  { %v1565_v50 = vpack.c.bf16 %v1528_v34, %v1527_v42  ;;  %v1910_v9 = vrot.slane %v1655_v55, %v3090_v14  ;;  %v1914_v10 = vrot.slane %v1656_v56, %v3093_v15 }
 0x1c4   :  { %v1446_v0 = vpop.xlane.xlu0 %1445  ;;  %v1437_v1 = vpop.xlane.xlu1 %1436 }
 0x1c5   :  { %v1526_v35 = vmul.f32 0.00390625, %v1437_v1  ;;  %v1529_v49 = vmul.f32 0.00390625, %v1446_v0  ;;  %v1654_v0 = vunpack.c.h.b16 %v1562_v30  ;;  %v1900_v1 = vrot.slane %v1653_v48, %v3096_v22 }
 0x1c6   :  { %v1659_v3 = vunpack.c.l.b16 %v1565_v50  ;;  %v1660_v5 = vunpack.c.h.b16 %v1565_v50  ;;  %v1915_v34 = vsel %vm1682_vm2, %v1914_v10, %v1910_v9 }
 0x1c7   :  { %v1564_v51 = vpack.c.bf16 %v1526_v35, %v1525_v43  ;;  %v1901_v25 = vsel %vm1689_vm3, %v1900_v1, %v1896_v52 }
 0x1c8   :  { %v1449_v26 = vpop.xlane.xlu1 %1448  ;;  %v1452_v27 = vpop.xlane.xlu0 %1451  ;;  %v1929_v29 = vrot.slane %v1659_v3, %v3090_v14  ;;  %v1933_v30 = vrot.slane %v1660_v5, %v3093_v15 }
 0x1c9   :  { %v1530_v38 = vmul.f32 0.00390625, %v1449_v26  ;;  %v1531_v53 = vmul.f32 0.00390625, %v1452_v27  ;;  %v1657_v7 = vunpack.c.l.b16 %v1564_v51  ;;  %v1658_v12 = vunpack.c.h.b16 %v1564_v51 }
 0x1ca   :  { %v1905_v26 = vrot.slane %v1654_v0, %v3099_v23  ;;  %v1934_v48 = vsel %vm1682_vm2, %v1933_v30, %v1929_v29 }
 0x1cb   :  { %v1566_v57 = vpack.c.bf16 %v1530_v38, %v1529_v49  ;;  %v1919_v31 = vrot.slane %v1657_v7, %v3096_v22  ;;  %v1924_v35 = vrot.slane %v1658_v12, %v3099_v23 }
 0x1cc   :  { %v1464_v44 = vpop.xlane.xlu0 %1463  ;;  %v1455_v45 = vpop.xlane.xlu1 %1454  ;;  %v1906_v56 = vsel %vm1696_vm4, %v1905_v26, %v1901_v25 }
 0x1cd   :  { %v1532_v47 = vmul.f32 0.00390625, %v1455_v45  ;;  %v1535_v8 = vmul.f32 0.00390625, %v1464_v44  ;;  %v1661_v13 = vunpack.c.l.b16 %v1566_v57  ;;  %v1662_v33 = vunpack.c.h.b16 %v1566_v57 }
 0x1ce   :  { %v1920_v49 = vsel %vm1689_vm3, %v1919_v31, %v1915_v34  ;;  %v1999_v1 = vsel %vm1987_vm7, %v1906_v56, %v1998_v63 }
 0x1cf   :  { %v1567_v60 = vpack.c.bf16 %v1532_v47, %v1531_v53  ;;  %v1938_v24 = vrot.slane %v1661_v13, %v3096_v22  ;;  %v1943_v50 = vrot.slane %v1662_v33, %v3099_v23  ;;  %v1925_v58 = vsel %vm1696_vm4, %v1924_v35, %v1920_v49 }
 0x1d0   :  { %v1467_v61 = vpop.xlane.xlu1 %1466  ;;  %v1458_v62 = vpop.xlane.xlu0 %1457 }
 0x1d1   :  { %v1536_v2 = vmul.f32 0.00390625, %v1467_v61  ;;  %v1663_v17 = vunpack.c.l.b16 %v1567_v60  ;;  %v1664_v18 = vunpack.c.h.b16 %v1567_v60  ;;  %v1533_v27 = vmul.f32 0.00390625, %v1458_v62 }
 0x1d2   :  { %v1939_v51 = vsel %vm1689_vm3, %v1938_v24, %v1934_v48 }
 0x1d3   :  { %v1569_v19 = vpack.c.bf16 %v1536_v2, %v1535_v8  ;;  %v1948_v37 = vrot.slane %v1663_v17, %v3090_v14  ;;  %v1952_v38 = vrot.slane %v1664_v18, %v3093_v15  ;;  %v1944_v0 = vsel %vm1696_vm4, %v1943_v50, %v1939_v51 }
 0x1d4   :  { %v1461_v20 = vpop.xlane.xlu1 %1460  ;;  %v1470_v21 = vpop.xlane.xlu0 %1469 }
 0x1d5   :  { %v1534_v28 = vmul.f32 0.00390625, %v1461_v20  ;;  %v1667_v40 = vunpack.c.l.b16 %v1569_v19  ;;  %v1668_v41 = vunpack.c.h.b16 %v1569_v19  ;;  %v1537_v43 = vmul.f32 0.00390625, %v1470_v21 }
 0x1d6   :  { %v1953_v57 = vsel %vm1682_vm2, %v1952_v38, %v1948_v37 }
 0x1d7   :  { %v1568_v36 = vpack.c.bf16 %v1534_v28, %v1533_v27  ;;  %v1967_v39 = vrot.slane %v1667_v40, %v3090_v14  ;;  %v1971_v52 = vrot.slane %v1668_v41, %v3093_v15  ;;  %v2000_v15 = vsel %vm1989_vm8, %v1925_v58, %v1999_v1 }
 0x1d8   :  { %v1473_v42 = vpop.xlane.xlu1 %1472  ;;  %v2001_v7 = vsel %vm1991_vm9, %v1944_v0, %v2000_v15 }
 0x1d9   :  { %v1665_v44 = vunpack.c.l.b16 %v1568_v36  ;;  %v1666_v45 = vunpack.c.h.b16 %v1568_v36  ;;  %v1538_v32 = vmul.f32 0.00390625, %v1473_v42  ;;  %v1972_v5 = vsel %vm1682_vm2, %v1971_v52, %v1967_v39  ;;  %v2492_v42 = vld [vmem:[%s3329_s3] sm:$0xff] }
 0x1db   :  { %v1957_v53 = vrot.slane %v1665_v44, %v3096_v22  ;;  %v1962_v47 = vrot.slane %v1666_v45, %v3099_v23  ;;  %v1570_v55 = vpack.c.bf16 %v1538_v32, %v1537_v43 }
 0x1dd   :  { %v1958_v60 = vsel %vm1689_vm3, %v1957_v53, %v1953_v57  ;;  %v1669_v61 = vunpack.c.l.b16 %v1570_v55  ;;  %v1670_v62 = vunpack.c.h.b16 %v1570_v55 }
 0x1de   :  { %v1963_v2 = vsel %vm1696_vm4, %v1962_v47, %v1958_v60 }
 0x1df   :  { %v1976_v3 = vrot.slane %v1669_v61, %v3096_v22  ;;  %v1981_v14 = vrot.slane %v1670_v62, %v3099_v23  ;;  %v2002_v54 = vsel %vm1993_vm10, %v1963_v2, %v2001_v7 }
 0x1e1   :  { %v1977_v8 = vsel %vm1689_vm3, %v1976_v3, %v1972_v5 }
 0x1e2   :  { %v1982_v9 = vsel %vm1696_vm4, %v1981_v14, %v1977_v8 }
 0x1e3   :  { %v2003_v10 = vsel %vm1995_vm11, %v1982_v9, %v2002_v54 }
 0x1e4   :  { %v2004_v12 = vpack.c.b16 %v2003_v10, %v3164_v11 }
 0x1e6   :  { %2692 = vmatmul.mubr.msk.bf16.vlgmr.msra.gmra.mxu0 %vm2025_vm12, %v2004_v12 }
 0x2a6   :  { %v2063_v22 = vpop.f32.mrf.mxu0 }
 0x2a7   :  { %v2073_v23 = vrot.slane %v2063_v22, 4 }
 0x2a8   :  { %v2065_v13 = vpop.f32.mrf.mxu0 }
 0x2a9   :  { %v2074_v16 = vadd.f32 %v2073_v23, %v2063_v22  ;;  %2072 = vst [vmem:[#allocation3] sm:$0xff] %v2065_v13  ;;  %v3234_v17 = vsel %vm2494_vm13, %v2065_v13, -1e+30 }
 0x2aa   :  { %2509 = vmax.xlane.f32.xlu1 %v3234_v17  ;;  %v2067_v18 = vpop.f32.mrf.mxu0 }
 0x2ab   :  { %v2075_v19 = vrot.slane %v2074_v16, 2  ;;  %v2093_v20 = vrot.slane %v2067_v18, 4 }
 0x2ac   :  { %v2069_v25 = vpop.f32.mrf.mxu0 }
 0x2ad   :  { %v2076_v26 = vadd.f32 %v2075_v19, %v2074_v16  ;;  %v2094_v27 = vadd.f32 %v2093_v20, %v2067_v18  ;;  %v3237_v28 = vsel %vm2494_vm13, %v2069_v25, -1e+30 }
 0x2ae   :  { %2511 = vmax.xlane.f32.xlu1 %v3237_v28 }
 0x2af   :  { %v2077_v11 = vrot.slane %v2076_v26, 1  ;;  %v2095_v29 = vrot.slane %v2094_v27, 2 }
 0x2b1   :  { %v2096_v30 = vadd.f32 %v2095_v29, %v2094_v27  ;;  %v2078_v31 = vadd.f32 %v2077_v11, %v2076_v26 }
 0x2b3   :  { %v2097_v33 = vrot.slane %v2096_v30, 1  ;;  %v2080_v21 = vmul.f32 0.125, %v2078_v31 }
 0x2b5   :  { %v2098_v34 = vadd.f32 %v2097_v33, %v2096_v30  ;;  %v2081_v35 = vsub.f32 %v2063_v22, %v2080_v21 }
 0x2b7   :  { %v2099_v24 = vmul.f32 0.125, %v2098_v34  ;;  %v2082_v36 = vmul.f32 %v2081_v35, %v2081_v35  ;;  %v2356_v34 = vadd.s32 8, %v3077_v6 }
 0x2b9   :  { %v2100_v37 = vsub.f32 %v2067_v18, %v2099_v24  ;;  %v2083_v38 = vrot.slane %v2082_v36, 4  ;;  %v2357_v24 = vadd.s32 16, %v3077_v6  ;;  %vm2372_vm2 = vcmp.eq.s32.totalorder %v2356_v34, %v3069_v59 }
 0x2bb   :  { %v2101_v40 = vmul.f32 %v2100_v37, %v2100_v37  ;;  %v2084_v41 = vadd.f32 %v2083_v38, %v2082_v36  ;;  %vm2373_vm3 = vcmp.eq.s32.totalorder %v2357_v24, %v3069_v59 }
 0x2bd   :  { %v2102_v43 = vrot.slane %v2101_v40, 4  ;;  %v2085_v44 = vrot.slane %v2084_v41, 2 }
 0x2bf   :  { %v2103_v45 = vadd.f32 %v2102_v43, %v2101_v40  ;;  %2498 = vperm.xlu1 %2772, %v2492_v42   ;;  %v2086_v32 = vadd.f32 %v2085_v44, %v2084_v41  ;;  %v2358_v43 = vadd.s32 24, %v3077_v6 }
 0x2c1   :  { %v2104_v48 = vrot.slane %v2103_v45, 2  ;;  %v2087_v49 = vrot.slane %v2086_v32, 1  ;;  %vm2374_vm4 = vcmp.eq.s32.totalorder %v2358_v43, %v3069_v59 }
 0x2c3   :  { %v2105_v50 = vadd.f32 %v2104_v48, %v2103_v45  ;;  %2501 = vperm.xlu1 %2772, %v2493_v46   ;;  %v2088_v51 = vadd.f32 %v2087_v49, %v2086_v32  ;;  %v2359_v45 = vadd.s32 32, %v3077_v6 }
 0x2c5   :  { %v2106_v53 = vrot.slane %v2105_v50, 1  ;;  %v2089_v47 = vmul.f32 0.125, %v2088_v51  ;;  %vm2375_vm5 = vcmp.eq.s32.totalorder %v2359_v45, %v3069_v59 }
 0x2c7   :  { %v2107_v55 = vadd.f32 %v2106_v53, %v2105_v50  ;;  %v2090_v56 = vadd.f32 1e-05, %v2089_v47 }
 0x2c9   :  { %v2108_v57 = vmul.f32 0.125, %v2107_v55  ;;  %2782 = vrsqrt.f32 %v2090_v56 }
 0x2cb   :  { %v2109_v39 = vadd.f32 1e-05, %v2108_v57 }
 0x2cd   :  { %2784 = vrsqrt.f32 %v2109_v39  ;;  %v2360_v39 = vadd.s32 40, %v3077_v6 }
 0x2cf   :  { %vm2376_vm6 = vcmp.eq.s32.totalorder %v2360_v39, %v3069_v59 }
 0x2d6   :  { %v2783_v52 = vpop.eup %2782 }
 0x2d7   :  { %v2092_v58 = vmul.f32 %v2783_v52, %v2081_v35 }
 0x2d9   :  { %2112 = vxpose.xlu0.b32.start.end [1/1] (short) %v2092_v58, 128  ;;  %v2361_v58 = vadd.s32 48, %v3077_v6 }
 0x2da   :  { %v2785_v60 = vpop.eup %2784 }
 0x2db   :  { %v2111_v61 = vmul.f32 %v2785_v60, %v2100_v37  ;;  %vm2377_vm7 = vcmp.eq.s32.totalorder %v2361_v58, %v3069_v59 }
 0x2dd   :  { %2729 = vmatprep.subr.mxu0 %v2111_v61  ;;  %2755 = vmatprep.subr.mxu1 %v2111_v61 }
 0x2de   :  { %2730 = vmatpush3.msra.mxu0 %v2111_v61  ;;  %2756 = vmatpush3.msra.mxu1 %v2111_v61 }
 0x302   :  { %2773 = vset.pattern.permute.xlu0 %v2836_v4  ;;  %v2837_v4 = vmov 0.0  }
 0x333   :  { %v3247_v62 = vpop.xlane.xlu1 %2509 }
 0x334   :  { %v2513_v63 = vsub.f32 %v3234_v17, %v3247_v62 }
 0x336   :  { %v2515_v0 = vmul.f32 1.442695, %v2513_v63 }
 0x337   :  { %v3251_v1 = vpop.xlane.xlu1 %2511 }
 0x338   :  { %2786 = vpow2.f32 %v2515_v0  ;;  %v2514_v2 = vsub.f32 %v3237_v28, %v3251_v1 }
 0x33a   :  { %v2517_v3 = vmul.f32 1.442695, %v2514_v2 }
 0x33b   :  { %v2499_v14 = vpop.permute.xlu1 %2498 }
 0x33c   :  { %2788 = vpow2.f32 %v2517_v3  ;;  %vm2503_vm14 = vcmp.eq.s32.totalorder %v3069_v59, %v2499_v14 }
 0x33d   :  { %v2709_v7 = vsel %vm2503_vm14, 1.0, %v2837_v4 }
 0x33e   :  { %v2529_v8 = vmul.f32 %v2709_v7, %v3234_v17 }
 0x33f   :  { %v2502_v15 = vpop.permute.xlu1 %2501 }
 0x340   :  { %vm2504_vm15 = vcmp.eq.s32.totalorder %v3069_v59, %v2502_v15 }
 0x341   :  { %v2710_v9 = vsel %vm2504_vm15, 1.0, %v2837_v4 }
 0x342   :  { %v2530_v10 = vmul.f32 %v2710_v9, %v3237_v28  ;;  %v2363_v9 = vadd.s32 64, %v3077_v6 }
 0x344   :  { %vm2379_vm9 = vcmp.eq.s32.totalorder %v2363_v9, %v3069_v59 }
 0x345   :  { %v2787_v5 = vpop.eup %2786 }
 0x346   :  { %2519 = vadd.xlane.f32.xlu1 %v2787_v5 }
 0x349   :  { %v2789_v54 = vpop.eup %2788 }
 0x34a   :  { %2521 = vadd.xlane.f32.xlu0 %v2789_v54  ;;  %2531 = vadd.xlane.f32.xlu1 %v2529_v8  ;;  %v2362_v8 = vadd.s32 56, %v3077_v6 }
 0x34c   :  { %vm2378_vm8 = vcmp.eq.s32.totalorder %v2362_v8, %v3069_v59 }
 0x34e   :  { %2533 = vadd.xlane.f32.xlu1 %v2530_v10 }
 0x355   :  { %v2128_v12 = vpop.trf.xlu0 }
 0x356   :  { %2731 = vmatprep.mubr.msk.f32.mxu0 %vm2144_vm0, %v2128_v12 }
 0x359   :  { %v2129_v22 = vpop.trf.xlu0 }
 0x35a   :  { %2732 = vmatmul.mubr.msk.f32.vlgmr.msra.gmra.mxu0 %vm2144_vm0, %v2129_v22 }
 0x35d   :  { %v2130_v23 = vpop.trf.xlu0 }
 0x35e   :  { %2734 = vmatprep.mubr.msk.f32.mxu0 %vm2144_vm0, %v2130_v23 }
 0x361   :  { %v2131_v13 = vpop.trf.xlu0 }
 0x362   :  { %2735 = vmatmul.mubr.msk.f32.gmra.mxu0 %vm2144_vm0, %v2131_v13 }
 0x365   :  { %v2132_v16 = vpop.trf.xlu0 }
 0x366   :  { %2737 = vmatprep.mubr.msk.f32.mxu0 %vm2144_vm0, %v2132_v16 }
 0x369   :  { %v2133_v17 = vpop.trf.xlu0 }
 0x36a   :  { %2738 = vmatmul.mubr.msk.f32.gmra.mxu0 %vm2144_vm0, %v2133_v17 }
 0x36d   :  { %v2134_v18 = vpop.trf.xlu0 }
 0x36e   :  { %2740 = vmatprep.mubr.msk.f32.mxu1 %vm2144_vm0, %v2134_v18 }
 0x371   :  { %v2135_v19 = vpop.trf.xlu0 }
 0x372   :  { %2741 = vmatmul.mubr.msk.f32.vlgmr.msra.gmra.mxu1 %vm2144_vm0, %v2135_v19 }
 0x375   :  { %v2136_v20 = vpop.trf.xlu0 }
 0x376   :  { %2743 = vmatprep.mubr.msk.f32.mxu1 %vm2144_vm0, %v2136_v20 }
 0x379   :  { %v2137_v25 = vpop.trf.xlu0 }
 0x37a   :  { %2744 = vmatmul.mubr.msk.f32.gmra.mxu1 %vm2144_vm0, %v2137_v25  ;;  %v2364_v25 = vadd.s32 72, %v3077_v6 }
 0x37c   :  { %vm2380_vm10 = vcmp.eq.s32.totalorder %v2364_v25, %v3069_v59 }
 0x37d   :  { %v2138_v26 = vpop.trf.xlu0 }
 0x37e   :  { %2746 = vmatprep.mubr.msk.f32.mxu1 %vm2144_vm0, %v2138_v26 }
 0x381   :  { %v2139_v27 = vpop.trf.xlu0 }
 0x382   :  { %2747 = vmatmul.mubr.msk.f32.gmra.mxu1 %vm2144_vm0, %v2139_v27  ;;  %v2365_v27 = vadd.s32 80, %v3077_v6 }
 0x384   :  { %vm2381_vm11 = vcmp.eq.s32.totalorder %v2365_v27, %v3069_v59 }
 0x385   :  { %v2140_v28 = vpop.trf.xlu0 }
 0x386   :  { %2749 = vmatprep.mubr.msk.f32.mxu1 %vm2144_vm0, %v2140_v28 }
 0x389   :  { %v2141_v11 = vpop.trf.xlu0 }
 0x38a   :  { %2750 = vmatmul.mubr.msk.f32.gmra.mxu1 %vm2144_vm0, %v2141_v11 }
 0x38d   :  { %v2142_v29 = vpop.trf.xlu0 }
 0x38e   :  { %2752 = vmatprep.mubr.msk.f32.mxu1 %vm2144_vm0, %v2142_v29 }
 0x391   :  { %v2143_v30 = vpop.trf.xlu0 }
 0x392   :  { %2753 = vmatmul.mubr.msk.f32.gmra.mxu1 %vm2144_vm0, %v2143_v30 }
 0x3cf   :  { %v2520_v58 = vpop.xlane.xlu1 %2519 }
 0x3d0   :  { %2790 = vlog2.f32 %v2520_v58 }
 0x3dd   :  { %v2791_v25 = vpop.eup %2790 }
 0x3de   :  { %v2524_v27 = vmul.f32 0.6931472, %v2791_v25 }
 0x41a   :  { %v2733_v31 = vpop.f32.mrf.mxu0 }
 0x41b   :  { %v2339_v38 = vmul.f32 0.125, %v2733_v31 }
 0x41c   :  { %v2259_v33 = vpop.f32.mrf.mxu0 }
 0x41d   :  { %v2338_v36 = vmul.f32 0.125, %v2259_v33  ;;  %v2388_v32 = vsel %vm2372_vm2, %v2339_v38, 0.0  ;;  %v2425_v46 = vmul.f32 %v2339_v38, %v2339_v38  ;;  %v2367_v38 = vadd.s32 96, %v3077_v6 }
 0x41e   :  { %vm2537_vm2 = vcmask 7168  }
 0x41f   :  { %v2387_v41 = vsel %vm2371_vm1, %v2338_v36, 0.0  ;;  %v2424_v42 = vmul.f32 %v2338_v36, %v2338_v36  ;;  %vm2383_vm13 = vcmp.eq.s32.totalorder %v2367_v38, %v3069_v59  ;;  %vm2465_vm1 = vcmask 1040384  }
 0x420   :  { %v2403_v50 = vadd.f32 %v2388_v32, %v2387_v41 }
 0x421   :  { %v2440_v53 = vadd.f32 %v2425_v46, %v2424_v42 }
 0x422   :  { %v2736_v21 = vpop.f32.mrf.mxu0 }
 0x423   :  { %v2341_v47 = vmul.f32 0.125, %v2736_v21 }
 0x424   :  { %v2269_v35 = vpop.f32.mrf.mxu0 }
 0x425   :  { %v2340_v40 = vmul.f32 0.125, %v2269_v35  ;;  %v2390_v60 = vsel %vm2374_vm4, %v2341_v47, 0.0  ;;  %v2427_v61 = vmul.f32 %v2341_v47, %v2341_v47 }
 0x427   :  { %v2389_v48 = vsel %vm2373_vm3, %v2340_v40, 0.0  ;;  %v2426_v49 = vmul.f32 %v2340_v40, %v2340_v40 }
 0x428   :  { %v2404_v56 = vadd.f32 %v2403_v50, %v2389_v48 }
 0x429   :  { %v2441_v57 = vadd.f32 %v2440_v53, %v2426_v49  ;;  %v2368_v53 = vadd.s32 104, %v3077_v6 }
 0x42a   :  { %v2739_v37 = vpop.f32.mrf.mxu0  ;;  %v2405_v2 = vadd.f32 %v2404_v56, %v2390_v60 }
 0x42b   :  { %v2343_v3 = vmul.f32 0.125, %v2739_v37  ;;  %v2442_v14 = vadd.f32 %v2441_v57, %v2427_v61  ;;  %v2366_v37 = vadd.s32 88, %v3077_v6  ;;  %vm2384_vm14 = vcmp.eq.s32.totalorder %v2368_v53, %v3069_v59 }
 0x42c   :  { %v2279_v44 = vpop.f32.mrf.mxu0 }
 0x42d   :  { %v2342_v55 = vmul.f32 0.125, %v2279_v44  ;;  %v2392_v10 = vsel %vm2376_vm6, %v2343_v3, 0.0  ;;  %v2429_v12 = vmul.f32 %v2343_v3, %v2343_v3  ;;  %vm2382_vm12 = vcmp.eq.s32.totalorder %v2366_v37, %v3069_v59 }
 0x42f   :  { %v2391_v63 = vsel %vm2375_vm5, %v2342_v55, 0.0  ;;  %v2428_v0 = vmul.f32 %v2342_v55, %v2342_v55 }
 0x430   :  { %v2406_v5 = vadd.f32 %v2405_v2, %v2391_v63  ;;  %v2370_v2 = vadd.s32 120, %v3077_v6 }
 0x431   :  { %v2443_v7 = vadd.f32 %v2442_v14, %v2428_v0 }
 0x432   :  { %v2742_v51 = vpop.f32.mrf.mxu1  ;;  %v2407_v13 = vadd.f32 %v2406_v5, %v2392_v10  ;;  %vm2386_vm0 = vcmp.eq.s32.totalorder %v2370_v2, %v3069_v59 }
 0x433   :  { %v2444_v16 = vadd.f32 %v2443_v7, %v2429_v12  ;;  %v2345_v17 = vmul.f32 0.125, %v2742_v51 }
 0x434   :  { %v2289_v52 = vpop.f32.mrf.mxu1 }
 0x435   :  { %v2344_v15 = vmul.f32 0.125, %v2289_v52  ;;  %v2394_v28 = vsel %vm2378_vm8, %v2345_v17, 0.0  ;;  %v2431_v11 = vmul.f32 %v2345_v17, %v2345_v17  ;;  %v2369_v52 = vadd.s32 112, %v3077_v6 }
 0x437   :  { %v2393_v22 = vsel %vm2377_vm7, %v2344_v15, 0.0  ;;  %v2430_v23 = vmul.f32 %v2344_v15, %v2344_v15  ;;  %vm2385_vm15 = vcmp.eq.s32.totalorder %v2369_v52, %v3069_v59  ;;  %v2522_v15 = vpop.xlane.xlu0 %2521 }
 0x438   :  { %v2408_v19 = vadd.f32 %v2407_v13, %v2393_v22  ;;  %2792 = vlog2.f32 %v2522_v15 }
 0x439   :  { %v2445_v20 = vadd.f32 %v2444_v16, %v2430_v23 }
 0x43a   :  { %v2745_v4 = vpop.f32.mrf.mxu1  ;;  %v2409_v31 = vadd.f32 %v2408_v19, %v2394_v28 }
 0x43b   :  { %v2347_v21 = vmul.f32 0.125, %v2745_v4  ;;  %v2446_v34 = vadd.f32 %v2445_v20, %v2431_v11 }
 0x43c   :  { %v2299_v54 = vpop.f32.mrf.mxu1 }
 0x43d   :  { %v2346_v18 = vmul.f32 0.125, %v2299_v54  ;;  %v2396_v40 = vsel %vm2380_vm10, %v2347_v21, 0.0  ;;  %v2433_v41 = vmul.f32 %v2347_v21, %v2347_v21  ;;  %v2532_v21 = vpop.xlane.xlu1 %2531 }
 0x43f   :  { %v2395_v29 = vsel %vm2379_vm9, %v2346_v18, 0.0  ;;  %v2432_v30 = vmul.f32 %v2346_v18, %v2346_v18 }
 0x440   :  { %v2410_v24 = vadd.f32 %v2409_v31, %v2395_v29 }
 0x441   :  { %v2447_v36 = vadd.f32 %v2446_v34, %v2432_v30  ;;  %v2527_v30 = vadd.f32 %v2524_v27, %v3247_v62 }
 0x442   :  { %v2748_v26 = vpop.f32.mrf.mxu1  ;;  %v2411_v44 = vadd.f32 %v2410_v24, %v2396_v40 }
 0x443   :  { %v2349_v32 = vmul.f32 0.125, %v2748_v26  ;;  %v2448_v46 = vadd.f32 %v2447_v36, %v2433_v41  ;;  %v2535_v34 = vsub.f32 %v2527_v30, %v2532_v21  ;;  %v2534_v36 = vpop.xlane.xlu1 %2533 }
 0x444   :  { %v2309_v33 = vpop.f32.mrf.mxu1 }
 0x445   :  { %v2348_v35 = vmul.f32 0.125, %v2309_v33  ;;  %v2398_v47 = vsel %vm2382_vm12, %v2349_v32, 0.0  ;;  %v2435_v55 = vmul.f32 %v2349_v32, %v2349_v32  ;;  %v2793_v59 = vpop.eup %2792  ;;  %v2538_v38 = vsel %vm2537_vm2, %v2535_v34, 0.0 }
 0x446   :  { %v2526_v29 = vmul.f32 0.6931472, %v2793_v59 }
 0x447   :  { %v2397_v42 = vsel %vm2381_vm11, %v2348_v35, 0.0  ;;  %v2434_v43 = vmul.f32 %v2348_v35, %v2348_v35 }
 0x448   :  { %v2412_v48 = vadd.f32 %v2411_v44, %v2397_v42  ;;  %v2528_v35 = vadd.f32 %v2526_v29, %v3251_v1 }
 0x449   :  { %v2449_v50 = vadd.f32 %v2448_v46, %v2434_v43 }
 0x44a   :  { %v2751_v45 = vpop.f32.mrf.mxu1  ;;  %v2413_v39 = vadd.f32 %v2412_v48, %v2398_v47  ;;  %v2536_v37 = vsub.f32 %v2528_v35, %v2534_v36 }
 0x44b   :  { %v2351_v60 = vmul.f32 0.125, %v2751_v45  ;;  %v2450_v61 = vadd.f32 %v2449_v50, %v2435_v55 }
 0x44c   :  { %v2319_v49 = vpop.f32.mrf.mxu1  ;;  %v2551_v40 = vsel %vm2537_vm2, %v2536_v37, 0.0 }
 0x44d   :  { %v2350_v51 = vmul.f32 0.125, %v2319_v49  ;;  %v2400_v5 = vsel %vm2384_vm14, %v2351_v60, 0.0  ;;  %v2437_v4 = vmul.f32 %v2351_v60, %v2351_v60 }
 0x44f   :  { %v2399_v56 = vsel %vm2383_vm13, %v2350_v51, 0.0  ;;  %v2436_v57 = vmul.f32 %v2350_v51, %v2350_v51 }
 0x450   :  { %v2414_v63 = vadd.f32 %v2413_v39, %v2399_v56 }
 0x451   :  { %v2451_v3 = vadd.f32 %v2450_v61, %v2436_v57 }
 0x452   :  { %v2754_v0 = vpop.f32.mrf.mxu1  ;;  %v2415_v54 = vadd.f32 %v2414_v63, %v2400_v5 }
 0x453   :  { %v2353_v7 = vmul.f32 0.125, %v2754_v0  ;;  %v2452_v12 = vadd.f32 %v2451_v3, %v2437_v4 }
 0x454   :  { %v2329_v14 = vpop.f32.mrf.mxu1 }
 0x455   :  { %v2352_v8 = vmul.f32 0.125, %v2329_v14  ;;  %v2402_v23 = vsel %vm2386_vm0, %v2353_v7, 0.0  ;;  %v2439_v6 = vmul.f32 %v2353_v7, %v2353_v7 }
 0x457   :  { %v2401_v9 = vsel %vm2385_vm15, %v2352_v8, 0.0  ;;  %v2438_v10 = vmul.f32 %v2352_v8, %v2352_v8 }
 0x458   :  { %v2416_v22 = vadd.f32 %v2415_v54, %v2401_v9 }
 0x459   :  { %v2453_v13 = vadd.f32 %v2452_v12, %v2438_v10 }
 0x45a   :  { %v2417_v16 = vadd.f32 %v2416_v22, %v2402_v23 }
 0x45b   :  { %v2454_v17 = vadd.f32 %v2453_v13, %v2439_v6 }
 0x45c   :  { %v2418_v18 = vrot.slane %v2417_v16, 4 }
 0x45d   :  { %2455 = vadd.xlane.f32.xlu1 %v2454_v17 }
 0x45e   :  { %v2419_v19 = vadd.f32 %v2418_v18, %v2417_v16 }
 0x460   :  { %v2420_v20 = vrot.slane %v2419_v19, 2 }
 0x462   :  { %v2421_v26 = vadd.f32 %v2420_v20, %v2419_v19 }
 0x464   :  { %v2422_v28 = vrot.slane %v2421_v26, 1 }
 0x466   :  { %v2423_v11 = vadd.f32 %v2422_v28, %v2421_v26 }
 0x468   :  { %v2476_v31 = vsel %vm2465_vm1, %v2423_v11, 0.0  ;;  %v2464_v33 = vmul.f32 %v2423_v11, %v2423_v11 }
 0x469   :  { %2477 = vadd.xlane.f32.xlu1 %v2476_v31 }
 0x46a   :  { %v2466_v24 = vsel %vm2465_vm1, %v2464_v33, 0.0 }
 0x46d   :  { %2467 = vadd.xlane.f32.xlu1 %v2466_v24 }
 0x471   :  { %2539 = vadd.xlane.f32.xlu1 %v2538_v38 }
 0x475   :  { %2552 = vadd.xlane.f32.xlu1 %v2551_v40 }
 0x476   :  { %2813 = shalt.err (!%p2810_p4)
}
 0x477   :  { %2592 = dma.vmem_to_hbm [thread:$0]  %s2590_s8, 128, %s3331_s5, [#allocation4]  }
 0x478   :  { %s2573_s18 = ssub.f32 1.0, %s3312_s26  ;;  %s2840_s24 = smov [#allocation7]  }
 0x4e6   :  { %v2456_v62 = vpop.xlane.xlu1 %2455 }
 0x4e7   :  { %v2457_v1 = vrot.slane %v2456_v62, 4 }
 0x4e9   :  { %v2458_v41 = vadd.f32 %v2457_v1, %v2456_v62 }
 0x4eb   :  { %v2459_v42 = vrot.slane %v2458_v41, 2 }
 0x4ed   :  { %v2460_v43 = vadd.f32 %v2459_v42, %v2458_v41 }
 0x4ef   :  { %v2461_v44 = vrot.slane %v2460_v43, 1 }
 0x4f1   :  { %v2462_v45 = vadd.f32 %v2461_v44, %v2460_v43 }
 0x4f2   :  { %v2478_v32 = vpop.xlane.xlu1 %2477 }
 0x4f3   :  { %v2479_v46 = vrot.slane %v2478_v32, 4  ;;  %2757 = vpush %v2462_v45 }
 0x4f5   :  { %v2480_v48 = vadd.f32 %v2479_v46, %v2478_v32 }
 0x4f6   :  { %v2468_v49 = vpop.xlane.xlu1 %2467 }
 0x4f7   :  { %v2481_v50 = vrot.slane %v2480_v48, 2  ;;  %v2469_v51 = vrot.slane %v2468_v49, 4 }
 0x4f9   :  { %v2470_v53 = vadd.f32 %v2469_v51, %v2468_v49  ;;  %v2482_v55 = vadd.f32 %v2481_v50, %v2480_v48 }
 0x4fa   :  { %v2540_v47 = vpop.xlane.xlu1 %2539 }
 0x4fb   :  { %v2471_v56 = vrot.slane %v2470_v53, 2  ;;  %v2541_v57 = vrot.slane %v2540_v47, 4  ;;  %v2483_v60 = vrot.slane %v2482_v55, 1 }
 0x4fd   :  { %v2542_v39 = vadd.f32 %v2541_v57, %v2540_v47  ;;  %v2472_v52 = vadd.f32 %v2471_v56, %v2470_v53  ;;  %v2484_v15 = vadd.f32 %v2483_v60, %v2482_v55 }
 0x4fe   :  { %v2553_v58 = vpop.xlane.xlu1 %2552 }
 0x4ff   :  { %v2543_v61 = vrot.slane %v2542_v39, 2  ;;  %v2554_v63 = vrot.slane %v2553_v58, 4  ;;  %v2473_v0 = vrot.slane %v2472_v52, 1 }
 0x501   :  { %v2555_v2 = vadd.f32 %v2554_v63, %v2553_v58  ;;  %v2474_v3 = vadd.f32 %v2473_v0, %v2472_v52  ;;  %v2544_v14 = vadd.f32 %v2543_v61, %v2542_v39 }
 0x503   :  { %v2556_v5 = vrot.slane %v2555_v2, 2  ;;  %2759 = vpush %v2474_v3  ;;  %v2545_v4 = vrot.slane %v2544_v14, 1 }
 0x504   :  { %2761 = vpush %v2484_v15 }
 0x505   :  { %v2557_v7 = vadd.f32 %v2556_v5, %v2555_v2  ;;  %v2546_v8 = vadd.f32 %v2545_v4, %v2544_v14 }
 0x507   :  { %2763 = vpush %v2546_v8  ;;  %v2558_v54 = vrot.slane %v2557_v7, 1 }
 0x509   :  { %v2559_v9 = vadd.f32 %v2558_v54, %v2557_v7 }
 0x50b   :  { %2765 = vpush %v2559_v9 }
 0x524   :  { %s2758_s5 = spop %2757 }
 0x534   :  { %s2760_s6 = spop %2759 }
 0x535   :  { %s2762_s11 = spop %2761  ;;  %s2489_s12 = ssub.f32 %s2758_s5, %s2760_s6 }
 0x536   :  { %s2486_s0 = smul.f32 2.0, %s2762_s11 }
 0x537   :  { %s2490_s15 = smul.f32 0.005, %s2489_s12 }
 0x538   :  { %s2487_s13 = ssub.f32 %s2760_s6, %s2486_s0  ;;  %s2764_s14 = spop %2763 }
 0x539   :  { %s2550_s17 = smul.f32 0.125, %s2764_s14 }
 0x53a   :  { %s2488_s16 = sadd.f32 128.0, %s2487_s13 }
 0x53c   :  { %s2491_s19 = sadd.f32 %s2490_s15, %s2488_s16  ;;  %s2766_s2 = spop %2765 }
 0x53d   :  { %s2563_s1 = smul.f32 0.125, %s2766_s2 }
 0x53e   :  { %s2576_s20 = smul.f32 0.00011111111, %s2491_s19 }
 0x53f   :  { %s2571_s21 = sadd.f32 %s2563_s1, %s2550_s17 }
 0x540   :  { %s2577_s3 = smul.f32 %s2576_s20, %s2573_s18 }
 0x541   :  { %s2572_s22 = smul.f32 %s2571_s21, %s3312_s26 }
 0x543   :  { %s2578_s23 = sadd.f32 %s2577_s3, %s2572_s22 }
 0x545   :  { %2582 = sst [smem:[#allocation7]] %s2578_s23 }
 0x546   :  { %2608 = dma.smem_to_hbm %s2840_s24, 16, %s3333_s7, [#allocation8]  }
 0x547   :  { %2830 = dma.done.wait [#allocation4], 128  }
 0x548   :  { %2831 = vsyncadd [#allocation4], 4294967168 }
 0x549   :  { %2832 = dma.done.wait [#allocation5], 16  }
 0x54a   :  { %2833 = vsyncadd [#allocation5], 4294967280 }
 0x54b   :  { %2834 = dma.done.wait [#allocation8], 16  }
 0x54c   :  { %2835 = vsyncadd [#allocation8], 4294967280 }
 0x54d   :  { %2618 = sfence }
 0x54e   :  { %2619 = vsyncpa [#allocation4], 1 }
 0x54f   :  { %2620 = vsyncpa [#allocation5], 1 }
 0x550   :  { %2621 = vsyncpa [#allocation8], 1 }

</bundles_post_ra>
